<compile_context>
chip_gen: v7x
topology: tpu7x:2x2x1
jax: 0.10.0
libtpu: 0.0.40
codegen_flags: <defaults>
</compile_context>

<pallas_src>
import functools
import math

import jax
import jax.numpy as jnp
from jax import lax
from jax.experimental import pallas as pl
from jax.experimental.pallas import tpu as pltpu

# ---- mini-DistilBERT config (synthetic weights, no checkpoint load) ----------
VOCAB = 100
MAX_POS = 16
HIDDEN = 32
N_HEADS = 4
HEAD_DIM = HIDDEN // N_HEADS
FFN_DIM = 64
N_LAYERS = 2
NUM_CLASSES = 5
EPS = 1e-12
NEG_BIAS = -1e9        # additive attention-mask bias (pad keys / cross-batch blocks)
CLS_PAD = 128          # lane-dense classifier output width (real logits in [:NUM_CLASSES])


# ------------------------------ in-kernel helpers -----------------------------
def _ln(x, g, b):
    # PyTorch nn.LayerNorm semantics (biased variance, eps inside rsqrt).
    mu = jnp.mean(x, axis=-1, keepdims=True)
    var = jnp.mean(jnp.square(x - mu), axis=-1, keepdims=True)
    return (x - mu) * jax.lax.rsqrt(var + EPS) * g + b


# --------------------------------- fused kernel -------------------------------
def _bert_fused_kernel(h0_ref, bias_ref,
                       wqkv_ref, bqkv_ref, wo_ref, bo_ref, ln_ref,
                       w1_ref, b1_ref, w2_ref, b2_ref,
                       emb_ln_ref, wc_ref, bc_ref,
                       o_ref, *, B, S):
    """Whole forward: emb-LayerNorm -> N_LAYERS x (MHSA + FFN) -> CLS classifier, one kernel."""
    emb_ln = emb_ln_ref[...]                                   # (2, H): [gamma; beta]
    h = _ln(h0_ref[...], emb_ln[0:1, :], emb_ln[1:2, :])       # (B*S, H)

    # (B*S, B*S) additive bias: 0 = same-batch & unmasked key, -1e9 otherwise.
    # Loaded ONCE; reused across all layers and heads (no per-head broadcast).
    attn_bias = bias_ref[...]

    for l in range(N_LAYERS):                                  # static unroll (2 layers)
        x = h

        # ---- fused QKV projection: one (B*S, H) @ (H, 3H) matmul ----
        # 1/sqrt(HEAD_DIM) is already folded into the Q columns of wqkv/bqkv at init time.
        qkv = jnp.dot(x, wqkv_ref[l], preferred_element_type=jnp.float32) + bqkv_ref[l]
        q = qkv[:, 0 * HIDDEN:1 * HIDDEN]
        k = qkv[:, 1 * HIDDEN:2 * HIDDEN]
        v = qkv[:, 2 * HIDDEN:3 * HIDDEN]

        # ---- attention over the folded (B*S) row axis: one score + one PV matmul per head ----
        ctx_heads = []
        for hh in range(N_HEADS):                              # static unroll over heads
            c0 = hh * HEAD_DIM
            q_h = q[:, c0:c0 + HEAD_DIM]                       # (B*S, dH)
            k_h = k[:, c0:c0 + HEAD_DIM]
            v_h = v[:, c0:c0 + HEAD_DIM]
            # contracting dims (1,1): K transpose folded into the MXU operand path (no XLU .T)
            s = lax.dot_general(q_h, k_h, (((1,), (1,)), ((), ())),
                                preferred_element_type=jnp.float32) + attn_bias
            s = s - jnp.max(s, axis=-1, keepdims=True)
            p = jnp.exp(s)
            p = p * pl.reciprocal(jnp.sum(p, axis=-1, keepdims=True), approx=True)
            ctx_heads.append(jnp.dot(p, v_h, preferred_element_type=jnp.float32))  # (B*S, dH)

        # lane-place heads into one (B*S, H) slab -> single Wo matmul per layer
        ctx = jnp.concatenate(ctx_heads, axis=1)
        attn = jnp.dot(ctx, wo_ref[l], preferred_element_type=jnp.float32) + bo_ref[l]

        lnl = ln_ref[l]                                        # (4, H): sa_g, sa_b, out_g, out_b
        h = _ln(x + attn, lnl[0:1, :], lnl[1:2, :])            # residual + sa_layer_norm

        # ---- FFN: lin1 -> GELU -> lin2, residual + output_layer_norm ----
        z = jnp.dot(h, w1_ref[l], preferred_element_type=jnp.float32) + b1_ref[l]
        # TODO(synk): DistilBERT uses exact erf-GELU; tanh-approx GELU used for TPU EUP lowering.
        z = jax.nn.gelu(z, approximate=True)
        y = jnp.dot(z, w2_ref[l], preferred_element_type=jnp.float32) + b2_ref[l]
        h = _ln(h + y, lnl[2:3, :], lnl[3:4, :])

    # ---- classifier on the B CLS rows only (static row gather), lane-dense (B, 128) store ----
    cls_h = jnp.concatenate([h[bb * S:bb * S + 1, :] for bb in range(B)], axis=0)   # (B, H)
    o_ref[...] = jnp.dot(cls_h, wc_ref[...], preferred_element_type=jnp.float32) + bc_ref[...]


# ------------------------------ forward pass (wrapper) -------------------------
@jax.jit
def bert_classifier_forward(params, input_ids, attention_mask):
    B, S = input_ids.shape
    # Embedding gathers are plain-JAX glue; dropout is identity (eval mode).
    h0 = params['word_emb'][input_ids] + params['pos_emb'][jnp.arange(S)][None, :, :]
    h0 = h0.reshape(B * S, HIDDEN).astype(jnp.float32)

    # Additive attention bias over the folded row axis: block-diagonal in batch (sequences
    # cannot attend across batches) combined with the key-padding mask. Built once per call.
    rows = jnp.arange(B * S)
    same_batch = (rows[:, None] // S) == (rows[None, :] // S)                   # (B*S, B*S)
    keep_key = (attention_mask.reshape(B * S) > 0)                              # (B*S,)
    attn_bias = jnp.where(same_batch & keep_key[None, :], 0.0, NEG_BIAS).astype(jnp.float32)

    kernel = functools.partial(_bert_fused_kernel, B=B, S=S)
    n_inputs = 14
    logits_pad = pl.pallas_call(
        kernel,
        out_shape=jax.ShapeDtypeStruct((B, CLS_PAD), jnp.float32),
        in_specs=[pl.BlockSpec(memory_space=pltpu.MemorySpace.VMEM)] * n_inputs,
        out_specs=pl.BlockSpec(memory_space=pltpu.MemorySpace.VMEM),
        compiler_params=pltpu.CompilerParams(vmem_limit_bytes=8 * 1024 * 1024),
    )(h0, attn_bias,
      params['wqkv'], params['bqkv'], params['wo'], params['bo'], params['ln'],
      params['w1'], params['b1'], params['w2'], params['b2'],
      params['emb_ln'], params['cls_w_pad'], params['cls_b_pad'])

    # Real logits live in the first NUM_CLASSES lanes.
    return logits_pad[:, :NUM_CLASSES]


# ------------------------------ parameter init ---------------------------------
def init_params(key):
    keys = iter(jax.random.split(key, 64))

    def nxt():
        return next(keys)

    def dense(fan_in, fan_out):
        w = jax.random.normal(nxt(), (fan_in, fan_out), jnp.float32) * 0.02
        b = jax.random.normal(nxt(), (1, fan_out), jnp.float32) * 0.02
        return w, b

    scale = 1.0 / math.sqrt(HEAD_DIM)
    wqkv, bqkv, wo, bo, ln, w1, b1, w2, b2 = ([] for _ in range(9))
    for _ in range(N_LAYERS):
        wq, bq = dense(HIDDEN, HIDDEN)
        wq, bq = wq * scale, bq * scale                         # fold 1/sqrt(dH) into Q proj
        wk, bk = dense(HIDDEN, HIDDEN)
        wv, bv = dense(HIDDEN, HIDDEN)
        wo_l, bo_l = dense(HIDDEN, HIDDEN)
        w1_l, b1_l = dense(HIDDEN, FFN_DIM)
        w2_l, b2_l = dense(FFN_DIM, HIDDEN)
        wqkv.append(jnp.concatenate([wq, wk, wv], axis=1))      # (H, 3H)
        bqkv.append(jnp.concatenate([bq, bk, bv], axis=1))      # (1, 3H)
        wo.append(wo_l); bo.append(bo_l)
        w1.append(w1_l); b1.append(b1_l)
        w2.append(w2_l); b2.append(b2_l)
        ln.append(jnp.stack([jnp.ones(HIDDEN, jnp.float32),     # sa_ln gamma
                             jnp.zeros(HIDDEN, jnp.float32),    # sa_ln beta
                             jnp.ones(HIDDEN, jnp.float32),     # out_ln gamma
                             jnp.zeros(HIDDEN, jnp.float32)]))  # out_ln beta

    cls_w, cls_b = dense(HIDDEN, NUM_CLASSES)
    cls_w_pad = jnp.zeros((HIDDEN, CLS_PAD), jnp.float32).at[:, :NUM_CLASSES].set(cls_w)
    cls_b_pad = jnp.zeros((1, CLS_PAD), jnp.float32).at[:, :NUM_CLASSES].set(cls_b)

    return dict(
        word_emb=jax.random.normal(nxt(), (VOCAB, HIDDEN), jnp.float32) * 0.02,
        pos_emb=jax.random.normal(nxt(), (MAX_POS, HIDDEN), jnp.float32) * 0.02,
        emb_ln=jnp.stack([jnp.ones(HIDDEN, jnp.float32), jnp.zeros(HIDDEN, jnp.float32)]),
        wqkv=jnp.stack(wqkv), bqkv=jnp.stack(bqkv),
        wo=jnp.stack(wo), bo=jnp.stack(bo), ln=jnp.stack(ln),
        w1=jnp.stack(w1), b1=jnp.stack(b1), w2=jnp.stack(w2), b2=jnp.stack(b2),
        cls_w_pad=cls_w_pad, cls_b_pad=cls_b_pad,
    )


# ----------------------------------- main ---------------------------------------
if __name__ == "__main__":
    key = jax.random.PRNGKey(0)
    pkey, ikey = jax.random.split(key)
    params = init_params(pkey)

    B, S = 2, 8
    input_ids = jax.random.randint(ikey, (B, S), 0, VOCAB, dtype=jnp.int32)
    attention_mask = jnp.array([[1, 1, 1, 1, 1, 1, 1, 1],
                                [1, 1, 1, 1, 1, 0, 0, 0]], dtype=jnp.int32)

    logits = bert_classifier_forward(params, input_ids, attention_mask)
    jax.block_until_ready(logits)
    assert logits.shape == (B, NUM_CLASSES)
    print("KERNEL_OK")
</pallas_src>

<mosaic_0001>
module attributes {stable_mosaic.version = 11 : i64} {
  func.func @_bert_fused_kernel(%arg0: memref<16x32xf32, #tpu.memory_space<vmem>>, %arg1: memref<16x16xf32, #tpu.memory_space<vmem>>, %arg2: memref<2x32x96xf32, #tpu.memory_space<vmem>>, %arg3: memref<2x1x96xf32, #tpu.memory_space<vmem>>, %arg4: memref<2x32x32xf32, #tpu.memory_space<vmem>>, %arg5: memref<2x1x32xf32, #tpu.memory_space<vmem>>, %arg6: memref<2x4x32xf32, #tpu.memory_space<vmem>>, %arg7: memref<2x32x64xf32, #tpu.memory_space<vmem>>, %arg8: memref<2x1x64xf32, #tpu.memory_space<vmem>>, %arg9: memref<2x64x32xf32, #tpu.memory_space<vmem>>, %arg10: memref<2x1x32xf32, #tpu.memory_space<vmem>>, %arg11: memref<2x32xf32, #tpu.memory_space<vmem>>, %arg12: memref<32x128xf32, #tpu.memory_space<vmem>>, %arg13: memref<1x128xf32, #tpu.memory_space<vmem>>, %arg14: memref<2x128xf32, #tpu.memory_space<vmem>>) attributes {dimension_semantics = [], scalar_prefetch = 0 : i64, scratch_operands = 0 : i64, tpu.core_type = #tpu.core_type<tc>} {
    %c0 = arith.constant 0 : index
    %c0_0 = arith.constant 0 : index
    %0 = vector.load %arg11[%c0, %c0_0] : memref<2x32xf32, #tpu.memory_space<vmem>>, vector<2x32xf32>
    %c0_1 = arith.constant 0 : index
    %c0_2 = arith.constant 0 : index
    %1 = vector.load %arg0[%c0_1, %c0_2] : memref<16x32xf32, #tpu.memory_space<vmem>>, vector<16x32xf32>
    %2 = vector.extract_strided_slice %0 {offsets = [0, 0], sizes = [1, 32], strides = [1, 1]} : vector<2x32xf32> to vector<1x32xf32>
    %3 = vector.extract_strided_slice %0 {offsets = [1, 0], sizes = [1, 32], strides = [1, 1]} : vector<2x32xf32> to vector<1x32xf32>
    %cst = arith.constant dense<0.000000e+00> : vector<16xf32>
    %4 = vector.multi_reduction <add>, %1, %cst [1] : vector<16x32xf32> to vector<16xf32>
    %5 = vector.shape_cast %4 : vector<16xf32> to vector<16x1xf32>
    %cst_3 = arith.constant 3.200000e+01 : f32
    %6 = vector.broadcast %cst_3 : f32 to vector<16x1xf32>
    %7 = arith.divf %5, %6 : vector<16x1xf32>
    %8 = vector.broadcast %7 : vector<16x1xf32> to vector<16x32xf32>
    %9 = arith.subf %1, %8 : vector<16x32xf32>
    %10 = arith.mulf %9, %9 : vector<16x32xf32>
    %cst_4 = arith.constant dense<0.000000e+00> : vector<16xf32>
    %11 = vector.multi_reduction <add>, %10, %cst_4 [1] : vector<16x32xf32> to vector<16xf32>
    %12 = vector.shape_cast %11 : vector<16xf32> to vector<16x1xf32>
    %cst_5 = arith.constant 3.200000e+01 : f32
    %13 = vector.broadcast %cst_5 : f32 to vector<16x1xf32>
    %14 = arith.divf %12, %13 : vector<16x1xf32>
    %15 = vector.broadcast %7 : vector<16x1xf32> to vector<16x32xf32>
    %16 = arith.subf %1, %15 : vector<16x32xf32>
    %cst_6 = arith.constant 9.99999996E-13 : f32
    %17 = vector.broadcast %cst_6 : f32 to vector<16x1xf32>
    %18 = arith.addf %14, %17 : vector<16x1xf32>
    %19 = math.rsqrt %18 : vector<16x1xf32>
    %20 = vector.broadcast %19 : vector<16x1xf32> to vector<16x32xf32>
    %21 = arith.mulf %16, %20 : vector<16x32xf32>
    %22 = vector.broadcast %2 : vector<1x32xf32> to vector<16x32xf32>
    %23 = arith.mulf %21, %22 : vector<16x32xf32>
    %24 = vector.broadcast %3 : vector<1x32xf32> to vector<16x32xf32>
    %25 = arith.addf %23, %24 : vector<16x32xf32>
    %c0_7 = arith.constant 0 : index
    %c0_8 = arith.constant 0 : index
    %26 = vector.load %arg1[%c0_7, %c0_8] : memref<16x16xf32, #tpu.memory_space<vmem>>, vector<16x16xf32>
    %c0_9 = arith.constant 0 : index
    %c0_10 = arith.constant 0 : index
    %c0_11 = arith.constant 0 : index
    %27 = vector.load %arg2[%c0_9, %c0_10, %c0_11] : memref<2x32x96xf32, #tpu.memory_space<vmem>>, vector<1x32x96xf32>
    %28 = vector.shape_cast %27 : vector<1x32x96xf32> to vector<32x96xf32>
    %cst_12 = arith.constant dense<0.000000e+00> : vector<16x96xf32>
    %29 = tpu.matmul %25, %28, %cst_12 {dimension_numbers = #tpu.dot_dimension_numbers<[1], [0], [0], [1], [0, 0, 1, 1], [], []>} : vector<16x32xf32>, vector<32x96xf32>, vector<16x96xf32> -> vector<16x96xf32>
    %c0_13 = arith.constant 0 : index
    %c0_14 = arith.constant 0 : index
    %c0_15 = arith.constant 0 : index
    %30 = vector.load %arg3[%c0_13, %c0_14, %c0_15] : memref<2x1x96xf32, #tpu.memory_space<vmem>>, vector<1x1x96xf32>
    %31 = vector.shape_cast %30 : vector<1x1x96xf32> to vector<1x96xf32>
    %32 = vector.broadcast %31 : vector<1x96xf32> to vector<16x96xf32>
    %33 = arith.addf %29, %32 : vector<16x96xf32>
    %34 = vector.extract_strided_slice %33 {offsets = [0, 0], sizes = [16, 32], strides = [1, 1]} : vector<16x96xf32> to vector<16x32xf32>
    %35 = vector.extract_strided_slice %33 {offsets = [0, 32], sizes = [16, 32], strides = [1, 1]} : vector<16x96xf32> to vector<16x32xf32>
    %36 = vector.extract_strided_slice %33 {offsets = [0, 64], sizes = [16, 32], strides = [1, 1]} : vector<16x96xf32> to vector<16x32xf32>
    %37 = vector.extract_strided_slice %34 {offsets = [0, 0], sizes = [16, 8], strides = [1, 1]} : vector<16x32xf32> to vector<16x8xf32>
    %38 = vector.extract_strided_slice %35 {offsets = [0, 0], sizes = [16, 8], strides = [1, 1]} : vector<16x32xf32> to vector<16x8xf32>
    %39 = vector.extract_strided_slice %36 {offsets = [0, 0], sizes = [16, 8], strides = [1, 1]} : vector<16x32xf32> to vector<16x8xf32>
    %cst_16 = arith.constant dense<0.000000e+00> : vector<16x16xf32>
    %40 = tpu.matmul %37, %38, %cst_16 {dimension_numbers = #tpu.dot_dimension_numbers<[1], [1], [0], [0], [0, 0, 1, 0], [], []>} : vector<16x8xf32>, vector<16x8xf32>, vector<16x16xf32> -> vector<16x16xf32>
    %41 = arith.addf %40, %26 : vector<16x16xf32>
    %cst_17 = arith.constant dense<0xFF800000> : vector<16xf32>
    %42 = vector.multi_reduction <maximumf>, %41, %cst_17 [1] : vector<16x16xf32> to vector<16xf32>
    %43 = vector.shape_cast %42 : vector<16xf32> to vector<16x1xf32>
    %44 = vector.broadcast %43 : vector<16x1xf32> to vector<16x16xf32>
    %45 = arith.subf %41, %44 : vector<16x16xf32>
    %46 = math.exp %45 : vector<16x16xf32>
    %cst_18 = arith.constant dense<0.000000e+00> : vector<16xf32>
    %47 = vector.multi_reduction <add>, %46, %cst_18 [1] : vector<16x16xf32> to vector<16xf32>
    %48 = vector.shape_cast %47 : vector<16xf32> to vector<16x1xf32>
    %49 = tpu.reciprocal %48 {approx = true} : vector<16x1xf32> -> vector<16x1xf32>
    %50 = vector.broadcast %49 : vector<16x1xf32> to vector<16x16xf32>
    %51 = arith.mulf %46, %50 : vector<16x16xf32>
    %cst_19 = arith.constant dense<0.000000e+00> : vector<16x8xf32>
    %52 = tpu.matmul %51, %39, %cst_19 {dimension_numbers = #tpu.dot_dimension_numbers<[1], [0], [0], [1], [0, 0, 1, 1], [], []>} : vector<16x16xf32>, vector<16x8xf32>, vector<16x8xf32> -> vector<16x8xf32>
    %53 = vector.extract_strided_slice %34 {offsets = [0, 8], sizes = [16, 8], strides = [1, 1]} : vector<16x32xf32> to vector<16x8xf32>
    %54 = vector.extract_strided_slice %35 {offsets = [0, 8], sizes = [16, 8], strides = [1, 1]} : vector<16x32xf32> to vector<16x8xf32>
    %55 = vector.extract_strided_slice %36 {offsets = [0, 8], sizes = [16, 8], strides = [1, 1]} : vector<16x32xf32> to vector<16x8xf32>
    %cst_20 = arith.constant dense<0.000000e+00> : vector<16x16xf32>
    %56 = tpu.matmul %53, %54, %cst_20 {dimension_numbers = #tpu.dot_dimension_numbers<[1], [1], [0], [0], [0, 0, 1, 0], [], []>} : vector<16x8xf32>, vector<16x8xf32>, vector<16x16xf32> -> vector<16x16xf32>
    %57 = arith.addf %56, %26 : vector<16x16xf32>
    %cst_21 = arith.constant dense<0xFF800000> : vector<16xf32>
    %58 = vector.multi_reduction <maximumf>, %57, %cst_21 [1] : vector<16x16xf32> to vector<16xf32>
    %59 = vector.shape_cast %58 : vector<16xf32> to vector<16x1xf32>
    %60 = vector.broadcast %59 : vector<16x1xf32> to vector<16x16xf32>
    %61 = arith.subf %57, %60 : vector<16x16xf32>
    %62 = math.exp %61 : vector<16x16xf32>
    %cst_22 = arith.constant dense<0.000000e+00> : vector<16xf32>
    %63 = vector.multi_reduction <add>, %62, %cst_22 [1] : vector<16x16xf32> to vector<16xf32>
    %64 = vector.shape_cast %63 : vector<16xf32> to vector<16x1xf32>
    %65 = tpu.reciprocal %64 {approx = true} : vector<16x1xf32> -> vector<16x1xf32>
    %66 = vector.broadcast %65 : vector<16x1xf32> to vector<16x16xf32>
    %67 = arith.mulf %62, %66 : vector<16x16xf32>
    %cst_23 = arith.constant dense<0.000000e+00> : vector<16x8xf32>
    %68 = tpu.matmul %67, %55, %cst_23 {dimension_numbers = #tpu.dot_dimension_numbers<[1], [0], [0], [1], [0, 0, 1, 1], [], []>} : vector<16x16xf32>, vector<16x8xf32>, vector<16x8xf32> -> vector<16x8xf32>
    %69 = vector.extract_strided_slice %34 {offsets = [0, 16], sizes = [16, 8], strides = [1, 1]} : vector<16x32xf32> to vector<16x8xf32>
    %70 = vector.extract_strided_slice %35 {offsets = [0, 16], sizes = [16, 8], strides = [1, 1]} : vector<16x32xf32> to vector<16x8xf32>
    %71 = vector.extract_strided_slice %36 {offsets = [0, 16], sizes = [16, 8], strides = [1, 1]} : vector<16x32xf32> to vector<16x8xf32>
    %cst_24 = arith.constant dense<0.000000e+00> : vector<16x16xf32>
    %72 = tpu.matmul %69, %70, %cst_24 {dimension_numbers = #tpu.dot_dimension_numbers<[1], [1], [0], [0], [0, 0, 1, 0], [], []>} : vector<16x8xf32>, vector<16x8xf32>, vector<16x16xf32> -> vector<16x16xf32>
    %73 = arith.addf %72, %26 : vector<16x16xf32>
    %cst_25 = arith.constant dense<0xFF800000> : vector<16xf32>
    %74 = vector.multi_reduction <maximumf>, %73, %cst_25 [1] : vector<16x16xf32> to vector<16xf32>
    %75 = vector.shape_cast %74 : vector<16xf32> to vector<16x1xf32>
    %76 = vector.broadcast %75 : vector<16x1xf32> to vector<16x16xf32>
    %77 = arith.subf %73, %76 : vector<16x16xf32>
    %78 = math.exp %77 : vector<16x16xf32>
    %cst_26 = arith.constant dense<0.000000e+00> : vector<16xf32>
    %79 = vector.multi_reduction <add>, %78, %cst_26 [1] : vector<16x16xf32> to vector<16xf32>
    %80 = vector.shape_cast %79 : vector<16xf32> to vector<16x1xf32>
    %81 = tpu.reciprocal %80 {approx = true} : vector<16x1xf32> -> vector<16x1xf32>
    %82 = vector.broadcast %81 : vector<16x1xf32> to vector<16x16xf32>
    %83 = arith.mulf %78, %82 : vector<16x16xf32>
    %cst_27 = arith.constant dense<0.000000e+00> : vector<16x8xf32>
    %84 = tpu.matmul %83, %71, %cst_27 {dimension_numbers = #tpu.dot_dimension_numbers<[1], [0], [0], [1], [0, 0, 1, 1], [], []>} : vector<16x16xf32>, vector<16x8xf32>, vector<16x8xf32> -> vector<16x8xf32>
    %85 = vector.extract_strided_slice %34 {offsets = [0, 24], sizes = [16, 8], strides = [1, 1]} : vector<16x32xf32> to vector<16x8xf32>
    %86 = vector.extract_strided_slice %35 {offsets = [0, 24], sizes = [16, 8], strides = [1, 1]} : vector<16x32xf32> to vector<16x8xf32>
    %87 = vector.extract_strided_slice %36 {offsets = [0, 24], sizes = [16, 8], strides = [1, 1]} : vector<16x32xf32> to vector<16x8xf32>
    %cst_28 = arith.constant dense<0.000000e+00> : vector<16x16xf32>
    %88 = tpu.matmul %85, %86, %cst_28 {dimension_numbers = #tpu.dot_dimension_numbers<[1], [1], [0], [0], [0, 0, 1, 0], [], []>} : vector<16x8xf32>, vector<16x8xf32>, vector<16x16xf32> -> vector<16x16xf32>
    %89 = arith.addf %88, %26 : vector<16x16xf32>
    %cst_29 = arith.constant dense<0xFF800000> : vector<16xf32>
    %90 = vector.multi_reduction <maximumf>, %89, %cst_29 [1] : vector<16x16xf32> to vector<16xf32>
    %91 = vector.shape_cast %90 : vector<16xf32> to vector<16x1xf32>
    %92 = vector.broadcast %91 : vector<16x1xf32> to vector<16x16xf32>
    %93 = arith.subf %89, %92 : vector<16x16xf32>
    %94 = math.exp %93 : vector<16x16xf32>
    %cst_30 = arith.constant dense<0.000000e+00> : vector<16xf32>
    %95 = vector.multi_reduction <add>, %94, %cst_30 [1] : vector<16x16xf32> to vector<16xf32>
    %96 = vector.shape_cast %95 : vector<16xf32> to vector<16x1xf32>
    %97 = tpu.reciprocal %96 {approx = true} : vector<16x1xf32> -> vector<16x1xf32>
    %98 = vector.broadcast %97 : vector<16x1xf32> to vector<16x16xf32>
    %99 = arith.mulf %94, %98 : vector<16x16xf32>
    %cst_31 = arith.constant dense<0.000000e+00> : vector<16x8xf32>
    %100 = tpu.matmul %99, %87, %cst_31 {dimension_numbers = #tpu.dot_dimension_numbers<[1], [0], [0], [1], [0, 0, 1, 1], [], []>} : vector<16x16xf32>, vector<16x8xf32>, vector<16x8xf32> -> vector<16x8xf32>
    %101 = tpu.concatenate %52, %68, %84, %100 in 1 : vector<16x8xf32>, vector<16x8xf32>, vector<16x8xf32>, vector<16x8xf32> -> vector<16x32xf32>
    %c0_32 = arith.constant 0 : index
    %c0_33 = arith.constant 0 : index
    %c0_34 = arith.constant 0 : index
    %102 = vector.load %arg4[%c0_32, %c0_33, %c0_34] : memref<2x32x32xf32, #tpu.memory_space<vmem>>, vector<1x32x32xf32>
    %103 = vector.shape_cast %102 : vector<1x32x32xf32> to vector<32x32xf32>
    %cst_35 = arith.constant dense<0.000000e+00> : vector<16x32xf32>
    %104 = tpu.matmul %101, %103, %cst_35 {dimension_numbers = #tpu.dot_dimension_numbers<[1], [0], [0], [1], [0, 0, 1, 1], [], []>} : vector<16x32xf32>, vector<32x32xf32>, vector<16x32xf32> -> vector<16x32xf32>
    %c0_36 = arith.constant 0 : index
    %c0_37 = arith.constant 0 : index
    %c0_38 = arith.constant 0 : index
    %105 = vector.load %arg5[%c0_36, %c0_37, %c0_38] : memref<2x1x32xf32, #tpu.memory_space<vmem>>, vector<1x1x32xf32>
    %106 = vector.shape_cast %105 : vector<1x1x32xf32> to vector<1x32xf32>
    %107 = vector.broadcast %106 : vector<1x32xf32> to vector<16x32xf32>
    %108 = arith.addf %104, %107 : vector<16x32xf32>
    %c0_39 = arith.constant 0 : index
    %c0_40 = arith.constant 0 : index
    %c0_41 = arith.constant 0 : index
    %109 = vector.load %arg6[%c0_39, %c0_40, %c0_41] : memref<2x4x32xf32, #tpu.memory_space<vmem>>, vector<1x4x32xf32>
    %110 = vector.shape_cast %109 : vector<1x4x32xf32> to vector<4x32xf32>
    %111 = arith.addf %25, %108 : vector<16x32xf32>
    %112 = vector.extract_strided_slice %110 {offsets = [0, 0], sizes = [1, 32], strides = [1, 1]} : vector<4x32xf32> to vector<1x32xf32>
    %113 = vector.extract_strided_slice %110 {offsets = [1, 0], sizes = [1, 32], strides = [1, 1]} : vector<4x32xf32> to vector<1x32xf32>
    %cst_42 = arith.constant dense<0.000000e+00> : vector<16xf32>
    %114 = vector.multi_reduction <add>, %111, %cst_42 [1] : vector<16x32xf32> to vector<16xf32>
    %115 = vector.shape_cast %114 : vector<16xf32> to vector<16x1xf32>
    %cst_43 = arith.constant 3.200000e+01 : f32
    %116 = vector.broadcast %cst_43 : f32 to vector<16x1xf32>
    %117 = arith.divf %115, %116 : vector<16x1xf32>
    %118 = vector.broadcast %117 : vector<16x1xf32> to vector<16x32xf32>
    %119 = arith.subf %111, %118 : vector<16x32xf32>
    %120 = arith.mulf %119, %119 : vector<16x32xf32>
    %cst_44 = arith.constant dense<0.000000e+00> : vector<16xf32>
    %121 = vector.multi_reduction <add>, %120, %cst_44 [1] : vector<16x32xf32> to vector<16xf32>
    %122 = vector.shape_cast %121 : vector<16xf32> to vector<16x1xf32>
    %cst_45 = arith.constant 3.200000e+01 : f32
    %123 = vector.broadcast %cst_45 : f32 to vector<16x1xf32>
    %124 = arith.divf %122, %123 : vector<16x1xf32>
    %125 = vector.broadcast %117 : vector<16x1xf32> to vector<16x32xf32>
    %126 = arith.subf %111, %125 : vector<16x32xf32>
    %cst_46 = arith.constant 9.99999996E-13 : f32
    %127 = vector.broadcast %cst_46 : f32 to vector<16x1xf32>
    %128 = arith.addf %124, %127 : vector<16x1xf32>
    %129 = math.rsqrt %128 : vector<16x1xf32>
    %130 = vector.broadcast %129 : vector<16x1xf32> to vector<16x32xf32>
    %131 = arith.mulf %126, %130 : vector<16x32xf32>
    %132 = vector.broadcast %112 : vector<1x32xf32> to vector<16x32xf32>
    %133 = arith.mulf %131, %132 : vector<16x32xf32>
    %134 = vector.broadcast %113 : vector<1x32xf32> to vector<16x32xf32>
    %135 = arith.addf %133, %134 : vector<16x32xf32>
    %c0_47 = arith.constant 0 : index
    %c0_48 = arith.constant 0 : index
    %c0_49 = arith.constant 0 : index
    %136 = vector.load %arg7[%c0_47, %c0_48, %c0_49] : memref<2x32x64xf32, #tpu.memory_space<vmem>>, vector<1x32x64xf32>
    %137 = vector.shape_cast %136 : vector<1x32x64xf32> to vector<32x64xf32>
    %cst_50 = arith.constant dense<0.000000e+00> : vector<16x64xf32>
    %138 = tpu.matmul %135, %137, %cst_50 {dimension_numbers = #tpu.dot_dimension_numbers<[1], [0], [0], [1], [0, 0, 1, 1], [], []>} : vector<16x32xf32>, vector<32x64xf32>, vector<16x64xf32> -> vector<16x64xf32>
    %c0_51 = arith.constant 0 : index
    %c0_52 = arith.constant 0 : index
    %c0_53 = arith.constant 0 : index
    %139 = vector.load %arg8[%c0_51, %c0_52, %c0_53] : memref<2x1x64xf32, #tpu.memory_space<vmem>>, vector<1x1x64xf32>
    %140 = vector.shape_cast %139 : vector<1x1x64xf32> to vector<1x64xf32>
    %141 = vector.broadcast %140 : vector<1x64xf32> to vector<16x64xf32>
    %142 = arith.addf %138, %141 : vector<16x64xf32>
    %143 = arith.mulf %142, %142 : vector<16x64xf32>
    %144 = arith.mulf %142, %143 : vector<16x64xf32>
    %cst_54 = arith.constant 4.471500e-02 : f32
    %145 = vector.broadcast %cst_54 : f32 to vector<16x64xf32>
    %146 = arith.mulf %145, %144 : vector<16x64xf32>
    %147 = arith.addf %142, %146 : vector<16x64xf32>
    %cst_55 = arith.constant 0.797884583 : f32
    %148 = vector.broadcast %cst_55 : f32 to vector<16x64xf32>
    %149 = arith.mulf %148, %147 : vector<16x64xf32>
    %150 = math.tanh %149 : vector<16x64xf32>
    %cst_56 = arith.constant 1.000000e+00 : f32
    %151 = vector.broadcast %cst_56 : f32 to vector<16x64xf32>
    %152 = arith.addf %151, %150 : vector<16x64xf32>
    %cst_57 = arith.constant 5.000000e-01 : f32
    %153 = vector.broadcast %cst_57 : f32 to vector<16x64xf32>
    %154 = arith.mulf %153, %152 : vector<16x64xf32>
    %155 = arith.mulf %142, %154 : vector<16x64xf32>
    %c0_58 = arith.constant 0 : index
    %c0_59 = arith.constant 0 : index
    %c0_60 = arith.constant 0 : index
    %156 = vector.load %arg9[%c0_58, %c0_59, %c0_60] : memref<2x64x32xf32, #tpu.memory_space<vmem>>, vector<1x64x32xf32>
    %157 = vector.shape_cast %156 : vector<1x64x32xf32> to vector<64x32xf32>
    %cst_61 = arith.constant dense<0.000000e+00> : vector<16x32xf32>
    %158 = tpu.matmul %155, %157, %cst_61 {dimension_numbers = #tpu.dot_dimension_numbers<[1], [0], [0], [1], [0, 0, 1, 1], [], []>} : vector<16x64xf32>, vector<64x32xf32>, vector<16x32xf32> -> vector<16x32xf32>
    %c0_62 = arith.constant 0 : index
    %c0_63 = arith.constant 0 : index
    %c0_64 = arith.constant 0 : index
    %159 = vector.load %arg10[%c0_62, %c0_63, %c0_64] : memref<2x1x32xf32, #tpu.memory_space<vmem>>, vector<1x1x32xf32>
    %160 = vector.shape_cast %159 : vector<1x1x32xf32> to vector<1x32xf32>
    %161 = vector.broadcast %160 : vector<1x32xf32> to vector<16x32xf32>
    %162 = arith.addf %158, %161 : vector<16x32xf32>
    %163 = arith.addf %135, %162 : vector<16x32xf32>
    %164 = vector.extract_strided_slice %110 {offsets = [2, 0], sizes = [1, 32], strides = [1, 1]} : vector<4x32xf32> to vector<1x32xf32>
    %165 = vector.extract_strided_slice %110 {offsets = [3, 0], sizes = [1, 32], strides = [1, 1]} : vector<4x32xf32> to vector<1x32xf32>
    %cst_65 = arith.constant dense<0.000000e+00> : vector<16xf32>
    %166 = vector.multi_reduction <add>, %163, %cst_65 [1] : vector<16x32xf32> to vector<16xf32>
    %167 = vector.shape_cast %166 : vector<16xf32> to vector<16x1xf32>
    %cst_66 = arith.constant 3.200000e+01 : f32
    %168 = vector.broadcast %cst_66 : f32 to vector<16x1xf32>
    %169 = arith.divf %167, %168 : vector<16x1xf32>
    %170 = vector.broadcast %169 : vector<16x1xf32> to vector<16x32xf32>
    %171 = arith.subf %163, %170 : vector<16x32xf32>
    %172 = arith.mulf %171, %171 : vector<16x32xf32>
    %cst_67 = arith.constant dense<0.000000e+00> : vector<16xf32>
    %173 = vector.multi_reduction <add>, %172, %cst_67 [1] : vector<16x32xf32> to vector<16xf32>
    %174 = vector.shape_cast %173 : vector<16xf32> to vector<16x1xf32>
    %cst_68 = arith.constant 3.200000e+01 : f32
    %175 = vector.broadcast %cst_68 : f32 to vector<16x1xf32>
    %176 = arith.divf %174, %175 : vector<16x1xf32>
    %177 = vector.broadcast %169 : vector<16x1xf32> to vector<16x32xf32>
    %178 = arith.subf %163, %177 : vector<16x32xf32>
    %cst_69 = arith.constant 9.99999996E-13 : f32
    %179 = vector.broadcast %cst_69 : f32 to vector<16x1xf32>
    %180 = arith.addf %176, %179 : vector<16x1xf32>
    %181 = math.rsqrt %180 : vector<16x1xf32>
    %182 = vector.broadcast %181 : vector<16x1xf32> to vector<16x32xf32>
    %183 = arith.mulf %178, %182 : vector<16x32xf32>
    %184 = vector.broadcast %164 : vector<1x32xf32> to vector<16x32xf32>
    %185 = arith.mulf %183, %184 : vector<16x32xf32>
    %186 = vector.broadcast %165 : vector<1x32xf32> to vector<16x32xf32>
    %187 = arith.addf %185, %186 : vector<16x32xf32>
    %c1 = arith.constant 1 : index
    %c0_70 = arith.constant 0 : index
    %c0_71 = arith.constant 0 : index
    %188 = vector.load %arg2[%c1, %c0_70, %c0_71] : memref<2x32x96xf32, #tpu.memory_space<vmem>>, vector<1x32x96xf32>
    %189 = vector.shape_cast %188 : vector<1x32x96xf32> to vector<32x96xf32>
    %cst_72 = arith.constant dense<0.000000e+00> : vector<16x96xf32>
    %190 = tpu.matmul %187, %189, %cst_72 {dimension_numbers = #tpu.dot_dimension_numbers<[1], [0], [0], [1], [0, 0, 1, 1], [], []>} : vector<16x32xf32>, vector<32x96xf32>, vector<16x96xf32> -> vector<16x96xf32>
    %c1_73 = arith.constant 1 : index
    %c0_74 = arith.constant 0 : index
    %c0_75 = arith.constant 0 : index
    %191 = vector.load %arg3[%c1_73, %c0_74, %c0_75] : memref<2x1x96xf32, #tpu.memory_space<vmem>>, vector<1x1x96xf32>
    %192 = vector.shape_cast %191 : vector<1x1x96xf32> to vector<1x96xf32>
    %193 = vector.broadcast %192 : vector<1x96xf32> to vector<16x96xf32>
    %194 = arith.addf %190, %193 : vector<16x96xf32>
    %195 = vector.extract_strided_slice %194 {offsets = [0, 0], sizes = [16, 32], strides = [1, 1]} : vector<16x96xf32> to vector<16x32xf32>
    %196 = vector.extract_strided_slice %194 {offsets = [0, 32], sizes = [16, 32], strides = [1, 1]} : vector<16x96xf32> to vector<16x32xf32>
    %197 = vector.extract_strided_slice %194 {offsets = [0, 64], sizes = [16, 32], strides = [1, 1]} : vector<16x96xf32> to vector<16x32xf32>
    %198 = vector.extract_strided_slice %195 {offsets = [0, 0], sizes = [16, 8], strides = [1, 1]} : vector<16x32xf32> to vector<16x8xf32>
    %199 = vector.extract_strided_slice %196 {offsets = [0, 0], sizes = [16, 8], strides = [1, 1]} : vector<16x32xf32> to vector<16x8xf32>
    %200 = vector.extract_strided_slice %197 {offsets = [0, 0], sizes = [16, 8], strides = [1, 1]} : vector<16x32xf32> to vector<16x8xf32>
    %cst_76 = arith.constant dense<0.000000e+00> : vector<16x16xf32>
    %201 = tpu.matmul %198, %199, %cst_76 {dimension_numbers = #tpu.dot_dimension_numbers<[1], [1], [0], [0], [0, 0, 1, 0], [], []>} : vector<16x8xf32>, vector<16x8xf32>, vector<16x16xf32> -> vector<16x16xf32>
    %202 = arith.addf %201, %26 : vector<16x16xf32>
    %cst_77 = arith.constant dense<0xFF800000> : vector<16xf32>
    %203 = vector.multi_reduction <maximumf>, %202, %cst_77 [1] : vector<16x16xf32> to vector<16xf32>
    %204 = vector.shape_cast %203 : vector<16xf32> to vector<16x1xf32>
    %205 = vector.broadcast %204 : vector<16x1xf32> to vector<16x16xf32>
    %206 = arith.subf %202, %205 : vector<16x16xf32>
    %207 = math.exp %206 : vector<16x16xf32>
    %cst_78 = arith.constant dense<0.000000e+00> : vector<16xf32>
    %208 = vector.multi_reduction <add>, %207, %cst_78 [1] : vector<16x16xf32> to vector<16xf32>
    %209 = vector.shape_cast %208 : vector<16xf32> to vector<16x1xf32>
    %210 = tpu.reciprocal %209 {approx = true} : vector<16x1xf32> -> vector<16x1xf32>
    %211 = vector.broadcast %210 : vector<16x1xf32> to vector<16x16xf32>
    %212 = arith.mulf %207, %211 : vector<16x16xf32>
    %cst_79 = arith.constant dense<0.000000e+00> : vector<16x8xf32>
    %213 = tpu.matmul %212, %200, %cst_79 {dimension_numbers = #tpu.dot_dimension_numbers<[1], [0], [0], [1], [0, 0, 1, 1], [], []>} : vector<16x16xf32>, vector<16x8xf32>, vector<16x8xf32> -> vector<16x8xf32>
    %214 = vector.extract_strided_slice %195 {offsets = [0, 8], sizes = [16, 8], strides = [1, 1]} : vector<16x32xf32> to vector<16x8xf32>
    %215 = vector.extract_strided_slice %196 {offsets = [0, 8], sizes = [16, 8], strides = [1, 1]} : vector<16x32xf32> to vector<16x8xf32>
    %216 = vector.extract_strided_slice %197 {offsets = [0, 8], sizes = [16, 8], strides = [1, 1]} : vector<16x32xf32> to vector<16x8xf32>
    %cst_80 = arith.constant dense<0.000000e+00> : vector<16x16xf32>
    %217 = tpu.matmul %214, %215, %cst_80 {dimension_numbers = #tpu.dot_dimension_numbers<[1], [1], [0], [0], [0, 0, 1, 0], [], []>} : vector<16x8xf32>, vector<16x8xf32>, vector<16x16xf32> -> vector<16x16xf32>
    %218 = arith.addf %217, %26 : vector<16x16xf32>
    %cst_81 = arith.constant dense<0xFF800000> : vector<16xf32>
    %219 = vector.multi_reduction <maximumf>, %218, %cst_81 [1] : vector<16x16xf32> to vector<16xf32>
    %220 = vector.shape_cast %219 : vector<16xf32> to vector<16x1xf32>
    %221 = vector.broadcast %220 : vector<16x1xf32> to vector<16x16xf32>
    %222 = arith.subf %218, %221 : vector<16x16xf32>
    %223 = math.exp %222 : vector<16x16xf32>
    %cst_82 = arith.constant dense<0.000000e+00> : vector<16xf32>
    %224 = vector.multi_reduction <add>, %223, %cst_82 [1] : vector<16x16xf32> to vector<16xf32>
    %225 = vector.shape_cast %224 : vector<16xf32> to vector<16x1xf32>
    %226 = tpu.reciprocal %225 {approx = true} : vector<16x1xf32> -> vector<16x1xf32>
    %227 = vector.broadcast %226 : vector<16x1xf32> to vector<16x16xf32>
    %228 = arith.mulf %223, %227 : vector<16x16xf32>
    %cst_83 = arith.constant dense<0.000000e+00> : vector<16x8xf32>
    %229 = tpu.matmul %228, %216, %cst_83 {dimension_numbers = #tpu.dot_dimension_numbers<[1], [0], [0], [1], [0, 0, 1, 1], [], []>} : vector<16x16xf32>, vector<16x8xf32>, vector<16x8xf32> -> vector<16x8xf32>
    %230 = vector.extract_strided_slice %195 {offsets = [0, 16], sizes = [16, 8], strides = [1, 1]} : vector<16x32xf32> to vector<16x8xf32>
    %231 = vector.extract_strided_slice %196 {offsets = [0, 16], sizes = [16, 8], strides = [1, 1]} : vector<16x32xf32> to vector<16x8xf32>
    %232 = vector.extract_strided_slice %197 {offsets = [0, 16], sizes = [16, 8], strides = [1, 1]} : vector<16x32xf32> to vector<16x8xf32>
    %cst_84 = arith.constant dense<0.000000e+00> : vector<16x16xf32>
    %233 = tpu.matmul %230, %231, %cst_84 {dimension_numbers = #tpu.dot_dimension_numbers<[1], [1], [0], [0], [0, 0, 1, 0], [], []>} : vector<16x8xf32>, vector<16x8xf32>, vector<16x16xf32> -> vector<16x16xf32>
    %234 = arith.addf %233, %26 : vector<16x16xf32>
    %cst_85 = arith.constant dense<0xFF800000> : vector<16xf32>
    %235 = vector.multi_reduction <maximumf>, %234, %cst_85 [1] : vector<16x16xf32> to vector<16xf32>
    %236 = vector.shape_cast %235 : vector<16xf32> to vector<16x1xf32>
    %237 = vector.broadcast %236 : vector<16x1xf32> to vector<16x16xf32>
    %238 = arith.subf %234, %237 : vector<16x16xf32>
    %239 = math.exp %238 : vector<16x16xf32>
    %cst_86 = arith.constant dense<0.000000e+00> : vector<16xf32>
    %240 = vector.multi_reduction <add>, %239, %cst_86 [1] : vector<16x16xf32> to vector<16xf32>
    %241 = vector.shape_cast %240 : vector<16xf32> to vector<16x1xf32>
    %242 = tpu.reciprocal %241 {approx = true} : vector<16x1xf32> -> vector<16x1xf32>
    %243 = vector.broadcast %242 : vector<16x1xf32> to vector<16x16xf32>
    %244 = arith.mulf %239, %243 : vector<16x16xf32>
    %cst_87 = arith.constant dense<0.000000e+00> : vector<16x8xf32>
    %245 = tpu.matmul %244, %232, %cst_87 {dimension_numbers = #tpu.dot_dimension_numbers<[1], [0], [0], [1], [0, 0, 1, 1], [], []>} : vector<16x16xf32>, vector<16x8xf32>, vector<16x8xf32> -> vector<16x8xf32>
    %246 = vector.extract_strided_slice %195 {offsets = [0, 24], sizes = [16, 8], strides = [1, 1]} : vector<16x32xf32> to vector<16x8xf32>
    %247 = vector.extract_strided_slice %196 {offsets = [0, 24], sizes = [16, 8], strides = [1, 1]} : vector<16x32xf32> to vector<16x8xf32>
    %248 = vector.extract_strided_slice %197 {offsets = [0, 24], sizes = [16, 8], strides = [1, 1]} : vector<16x32xf32> to vector<16x8xf32>
    %cst_88 = arith.constant dense<0.000000e+00> : vector<16x16xf32>
    %249 = tpu.matmul %246, %247, %cst_88 {dimension_numbers = #tpu.dot_dimension_numbers<[1], [1], [0], [0], [0, 0, 1, 0], [], []>} : vector<16x8xf32>, vector<16x8xf32>, vector<16x16xf32> -> vector<16x16xf32>
    %250 = arith.addf %249, %26 : vector<16x16xf32>
    %cst_89 = arith.constant dense<0xFF800000> : vector<16xf32>
    %251 = vector.multi_reduction <maximumf>, %250, %cst_89 [1] : vector<16x16xf32> to vector<16xf32>
    %252 = vector.shape_cast %251 : vector<16xf32> to vector<16x1xf32>
    %253 = vector.broadcast %252 : vector<16x1xf32> to vector<16x16xf32>
    %254 = arith.subf %250, %253 : vector<16x16xf32>
    %255 = math.exp %254 : vector<16x16xf32>
    %cst_90 = arith.constant dense<0.000000e+00> : vector<16xf32>
    %256 = vector.multi_reduction <add>, %255, %cst_90 [1] : vector<16x16xf32> to vector<16xf32>
    %257 = vector.shape_cast %256 : vector<16xf32> to vector<16x1xf32>
    %258 = tpu.reciprocal %257 {approx = true} : vector<16x1xf32> -> vector<16x1xf32>
    %259 = vector.broadcast %258 : vector<16x1xf32> to vector<16x16xf32>
    %260 = arith.mulf %255, %259 : vector<16x16xf32>
    %cst_91 = arith.constant dense<0.000000e+00> : vector<16x8xf32>
    %261 = tpu.matmul %260, %248, %cst_91 {dimension_numbers = #tpu.dot_dimension_numbers<[1], [0], [0], [1], [0, 0, 1, 1], [], []>} : vector<16x16xf32>, vector<16x8xf32>, vector<16x8xf32> -> vector<16x8xf32>
    %262 = tpu.concatenate %213, %229, %245, %261 in 1 : vector<16x8xf32>, vector<16x8xf32>, vector<16x8xf32>, vector<16x8xf32> -> vector<16x32xf32>
    %c1_92 = arith.constant 1 : index
    %c0_93 = arith.constant 0 : index
    %c0_94 = arith.constant 0 : index
    %263 = vector.load %arg4[%c1_92, %c0_93, %c0_94] : memref<2x32x32xf32, #tpu.memory_space<vmem>>, vector<1x32x32xf32>
    %264 = vector.shape_cast %263 : vector<1x32x32xf32> to vector<32x32xf32>
    %cst_95 = arith.constant dense<0.000000e+00> : vector<16x32xf32>
    %265 = tpu.matmul %262, %264, %cst_95 {dimension_numbers = #tpu.dot_dimension_numbers<[1], [0], [0], [1], [0, 0, 1, 1], [], []>} : vector<16x32xf32>, vector<32x32xf32>, vector<16x32xf32> -> vector<16x32xf32>
    %c1_96 = arith.constant 1 : index
    %c0_97 = arith.constant 0 : index
    %c0_98 = arith.constant 0 : index
    %266 = vector.load %arg5[%c1_96, %c0_97, %c0_98] : memref<2x1x32xf32, #tpu.memory_space<vmem>>, vector<1x1x32xf32>
    %267 = vector.shape_cast %266 : vector<1x1x32xf32> to vector<1x32xf32>
    %268 = vector.broadcast %267 : vector<1x32xf32> to vector<16x32xf32>
    %269 = arith.addf %265, %268 : vector<16x32xf32>
    %c1_99 = arith.constant 1 : index
    %c0_100 = arith.constant 0 : index
    %c0_101 = arith.constant 0 : index
    %270 = vector.load %arg6[%c1_99, %c0_100, %c0_101] : memref<2x4x32xf32, #tpu.memory_space<vmem>>, vector<1x4x32xf32>
    %271 = vector.shape_cast %270 : vector<1x4x32xf32> to vector<4x32xf32>
    %272 = arith.addf %187, %269 : vector<16x32xf32>
    %273 = vector.extract_strided_slice %271 {offsets = [0, 0], sizes = [1, 32], strides = [1, 1]} : vector<4x32xf32> to vector<1x32xf32>
    %274 = vector.extract_strided_slice %271 {offsets = [1, 0], sizes = [1, 32], strides = [1, 1]} : vector<4x32xf32> to vector<1x32xf32>
    %cst_102 = arith.constant dense<0.000000e+00> : vector<16xf32>
    %275 = vector.multi_reduction <add>, %272, %cst_102 [1] : vector<16x32xf32> to vector<16xf32>
    %276 = vector.shape_cast %275 : vector<16xf32> to vector<16x1xf32>
    %cst_103 = arith.constant 3.200000e+01 : f32
    %277 = vector.broadcast %cst_103 : f32 to vector<16x1xf32>
    %278 = arith.divf %276, %277 : vector<16x1xf32>
    %279 = vector.broadcast %278 : vector<16x1xf32> to vector<16x32xf32>
    %280 = arith.subf %272, %279 : vector<16x32xf32>
    %281 = arith.mulf %280, %280 : vector<16x32xf32>
    %cst_104 = arith.constant dense<0.000000e+00> : vector<16xf32>
    %282 = vector.multi_reduction <add>, %281, %cst_104 [1] : vector<16x32xf32> to vector<16xf32>
    %283 = vector.shape_cast %282 : vector<16xf32> to vector<16x1xf32>
    %cst_105 = arith.constant 3.200000e+01 : f32
    %284 = vector.broadcast %cst_105 : f32 to vector<16x1xf32>
    %285 = arith.divf %283, %284 : vector<16x1xf32>
    %286 = vector.broadcast %278 : vector<16x1xf32> to vector<16x32xf32>
    %287 = arith.subf %272, %286 : vector<16x32xf32>
    %cst_106 = arith.constant 9.99999996E-13 : f32
    %288 = vector.broadcast %cst_106 : f32 to vector<16x1xf32>
    %289 = arith.addf %285, %288 : vector<16x1xf32>
    %290 = math.rsqrt %289 : vector<16x1xf32>
    %291 = vector.broadcast %290 : vector<16x1xf32> to vector<16x32xf32>
    %292 = arith.mulf %287, %291 : vector<16x32xf32>
    %293 = vector.broadcast %273 : vector<1x32xf32> to vector<16x32xf32>
    %294 = arith.mulf %292, %293 : vector<16x32xf32>
    %295 = vector.broadcast %274 : vector<1x32xf32> to vector<16x32xf32>
    %296 = arith.addf %294, %295 : vector<16x32xf32>
    %c1_107 = arith.constant 1 : index
    %c0_108 = arith.constant 0 : index
    %c0_109 = arith.constant 0 : index
    %297 = vector.load %arg7[%c1_107, %c0_108, %c0_109] : memref<2x32x64xf32, #tpu.memory_space<vmem>>, vector<1x32x64xf32>
    %298 = vector.shape_cast %297 : vector<1x32x64xf32> to vector<32x64xf32>
    %cst_110 = arith.constant dense<0.000000e+00> : vector<16x64xf32>
    %299 = tpu.matmul %296, %298, %cst_110 {dimension_numbers = #tpu.dot_dimension_numbers<[1], [0], [0], [1], [0, 0, 1, 1], [], []>} : vector<16x32xf32>, vector<32x64xf32>, vector<16x64xf32> -> vector<16x64xf32>
    %c1_111 = arith.constant 1 : index
    %c0_112 = arith.constant 0 : index
    %c0_113 = arith.constant 0 : index
    %300 = vector.load %arg8[%c1_111, %c0_112, %c0_113] : memref<2x1x64xf32, #tpu.memory_space<vmem>>, vector<1x1x64xf32>
    %301 = vector.shape_cast %300 : vector<1x1x64xf32> to vector<1x64xf32>
    %302 = vector.broadcast %301 : vector<1x64xf32> to vector<16x64xf32>
    %303 = arith.addf %299, %302 : vector<16x64xf32>
    %304 = arith.mulf %303, %303 : vector<16x64xf32>
    %305 = arith.mulf %303, %304 : vector<16x64xf32>
    %cst_114 = arith.constant 4.471500e-02 : f32
    %306 = vector.broadcast %cst_114 : f32 to vector<16x64xf32>
    %307 = arith.mulf %306, %305 : vector<16x64xf32>
    %308 = arith.addf %303, %307 : vector<16x64xf32>
    %cst_115 = arith.constant 0.797884583 : f32
    %309 = vector.broadcast %cst_115 : f32 to vector<16x64xf32>
    %310 = arith.mulf %309, %308 : vector<16x64xf32>
    %311 = math.tanh %310 : vector<16x64xf32>
    %cst_116 = arith.constant 1.000000e+00 : f32
    %312 = vector.broadcast %cst_116 : f32 to vector<16x64xf32>
    %313 = arith.addf %312, %311 : vector<16x64xf32>
    %cst_117 = arith.constant 5.000000e-01 : f32
    %314 = vector.broadcast %cst_117 : f32 to vector<16x64xf32>
    %315 = arith.mulf %314, %313 : vector<16x64xf32>
    %316 = arith.mulf %303, %315 : vector<16x64xf32>
    %c1_118 = arith.constant 1 : index
    %c0_119 = arith.constant 0 : index
    %c0_120 = arith.constant 0 : index
    %317 = vector.load %arg9[%c1_118, %c0_119, %c0_120] : memref<2x64x32xf32, #tpu.memory_space<vmem>>, vector<1x64x32xf32>
    %318 = vector.shape_cast %317 : vector<1x64x32xf32> to vector<64x32xf32>
    %cst_121 = arith.constant dense<0.000000e+00> : vector<16x32xf32>
    %319 = tpu.matmul %316, %318, %cst_121 {dimension_numbers = #tpu.dot_dimension_numbers<[1], [0], [0], [1], [0, 0, 1, 1], [], []>} : vector<16x64xf32>, vector<64x32xf32>, vector<16x32xf32> -> vector<16x32xf32>
    %c1_122 = arith.constant 1 : index
    %c0_123 = arith.constant 0 : index
    %c0_124 = arith.constant 0 : index
    %320 = vector.load %arg10[%c1_122, %c0_123, %c0_124] : memref<2x1x32xf32, #tpu.memory_space<vmem>>, vector<1x1x32xf32>
    %321 = vector.shape_cast %320 : vector<1x1x32xf32> to vector<1x32xf32>
    %322 = vector.broadcast %321 : vector<1x32xf32> to vector<16x32xf32>
    %323 = arith.addf %319, %322 : vector<16x32xf32>
    %324 = arith.addf %296, %323 : vector<16x32xf32>
    %325 = vector.extract_strided_slice %271 {offsets = [2, 0], sizes = [1, 32], strides = [1, 1]} : vector<4x32xf32> to vector<1x32xf32>
    %326 = vector.extract_strided_slice %271 {offsets = [3, 0], sizes = [1, 32], strides = [1, 1]} : vector<4x32xf32> to vector<1x32xf32>
    %cst_125 = arith.constant dense<0.000000e+00> : vector<16xf32>
    %327 = vector.multi_reduction <add>, %324, %cst_125 [1] : vector<16x32xf32> to vector<16xf32>
    %328 = vector.shape_cast %327 : vector<16xf32> to vector<16x1xf32>
    %cst_126 = arith.constant 3.200000e+01 : f32
    %329 = vector.broadcast %cst_126 : f32 to vector<16x1xf32>
    %330 = arith.divf %328, %329 : vector<16x1xf32>
    %331 = vector.broadcast %330 : vector<16x1xf32> to vector<16x32xf32>
    %332 = arith.subf %324, %331 : vector<16x32xf32>
    %333 = arith.mulf %332, %332 : vector<16x32xf32>
    %cst_127 = arith.constant dense<0.000000e+00> : vector<16xf32>
    %334 = vector.multi_reduction <add>, %333, %cst_127 [1] : vector<16x32xf32> to vector<16xf32>
    %335 = vector.shape_cast %334 : vector<16xf32> to vector<16x1xf32>
    %cst_128 = arith.constant 3.200000e+01 : f32
    %336 = vector.broadcast %cst_128 : f32 to vector<16x1xf32>
    %337 = arith.divf %335, %336 : vector<16x1xf32>
    %338 = vector.broadcast %330 : vector<16x1xf32> to vector<16x32xf32>
    %339 = arith.subf %324, %338 : vector<16x32xf32>
    %cst_129 = arith.constant 9.99999996E-13 : f32
    %340 = vector.broadcast %cst_129 : f32 to vector<16x1xf32>
    %341 = arith.addf %337, %340 : vector<16x1xf32>
    %342 = math.rsqrt %341 : vector<16x1xf32>
    %343 = vector.broadcast %342 : vector<16x1xf32> to vector<16x32xf32>
    %344 = arith.mulf %339, %343 : vector<16x32xf32>
    %345 = vector.broadcast %325 : vector<1x32xf32> to vector<16x32xf32>
    %346 = arith.mulf %344, %345 : vector<16x32xf32>
    %347 = vector.broadcast %326 : vector<1x32xf32> to vector<16x32xf32>
    %348 = arith.addf %346, %347 : vector<16x32xf32>
    %349 = vector.extract_strided_slice %348 {offsets = [0, 0], sizes = [1, 32], strides = [1, 1]} : vector<16x32xf32> to vector<1x32xf32>
    %350 = vector.extract_strided_slice %348 {offsets = [8, 0], sizes = [1, 32], strides = [1, 1]} : vector<16x32xf32> to vector<1x32xf32>
    %351 = tpu.concatenate %349, %350 in 0 : vector<1x32xf32>, vector<1x32xf32> -> vector<2x32xf32>
    %c0_130 = arith.constant 0 : index
    %c0_131 = arith.constant 0 : index
    %352 = vector.load %arg12[%c0_130, %c0_131] : memref<32x128xf32, #tpu.memory_space<vmem>>, vector<32x128xf32>
    %cst_132 = arith.constant dense<0.000000e+00> : vector<2x128xf32>
    %353 = tpu.matmul %351, %352, %cst_132 {dimension_numbers = #tpu.dot_dimension_numbers<[1], [0], [0], [1], [0, 0, 1, 1], [], []>} : vector<2x32xf32>, vector<32x128xf32>, vector<2x128xf32> -> vector<2x128xf32>
    %c0_133 = arith.constant 0 : index
    %c0_134 = arith.constant 0 : index
    %354 = vector.load %arg13[%c0_133, %c0_134] : memref<1x128xf32, #tpu.memory_space<vmem>>, vector<1x128xf32>
    %355 = vector.broadcast %354 : vector<1x128xf32> to vector<2x128xf32>
    %356 = arith.addf %353, %355 : vector<2x128xf32>
    %c0_135 = arith.constant 0 : index
    %c0_136 = arith.constant 0 : index
    %357 = vector.load %arg14[%c0_135, %c0_136] : memref<2x128xf32, #tpu.memory_space<vmem>>, vector<2x128xf32>
    tpu.vector_store %arg14[%c0_135, %c0_136], %356 {strides = array<i32>} : memref<2x128xf32, #tpu.memory_space<vmem>>, vector<2x128xf32>,
    return
  }
}

</mosaic_0001>

<bundles_post_ra>
// kernel: bert_classifier_forward.1
= control target key start
LH: loop header
LB: loop body
LE: loop exit
PB: predicated region body
PF: predicated region fallthrough
CT: control target
= control target key end

     0   :  { %vm51_vm0 = vcmask 261120   ;;  %s4263_s0 = inlined_call_operand.vmem [shape: f32[16,32], index: 0, kind: input, shape index: {}]   ;;  %s4264_s1 = inlined_call_operand.vmem [shape: f32[16,16], index: 1, kind: input, shape index: {}]   ;;  %s4265_s2 = inlined_call_operand.vmem [shape: f32[2,32,96], index: 2, kind: input, shape index: {}]   ;;  %s4266_s3 = inlined_call_operand.vmem [shape: f32[2,1,96], index: 3, kind: input, shape index: {}]   ;;  %s4267_s4 = inlined_call_operand.vmem [shape: f32[2,32,32], index: 4, kind: input, shape index: {}]   ;;  %s4268_s5 = inlined_call_operand.vmem [shape: f32[2,1,32], index: 5, kind: input, shape index: {}]   ;;  %s4269_s6 = inlined_call_operand.vmem [shape: f32[2,4,32], index: 6, kind: input, shape index: {}]   ;;  %s4270_s7 = inlined_call_operand.vmem [shape: f32[2,32,64], index: 7, kind: input, shape index: {}]   ;;  %s4271_s8 = inlined_call_operand.vmem [shape: f32[2,1,64], index: 8, kind: input, shape index: {}]   ;;  %s4272_s9 = inlined_call_operand.vmem [shape: f32[2,64,32], index: 9, kind: input, shape index: {}]   ;;  %s4273_s10 = inlined_call_operand.vmem [shape: f32[2,1,32], index: 10, kind: input, shape index: {}]   ;;  %s4274_s11 = inlined_call_operand.vmem [shape: f32[2,32], index: 11, kind: input, shape index: {}]   ;;  %s4275_s12 = inlined_call_operand.vmem [shape: f32[32,128], index: 12, kind: input, shape index: {}]   ;;  %s4276_s13 = inlined_call_operand.vmem [shape: f32[1,128], index: 13, kind: input, shape index: {}]   ;;  %s4277_s14 = inlined_call_operand.hbm [shape: f32[2,128], index: 14, kind: output, shape index: {}]  }
   0x1   :  { %v49_v0 = vld [vmem:[%s4263_s0] sm:$0xff]  ;;  %v50_v1 = vld [vmem:[%s4263_s0 + $0x8] sm:$0xff] }
   0x2   :  { %19 = vsyncpa [#allocation3], 0  ;;  %v52_v2 = vsel %vm51_vm0, %v49_v0, 0.0  ;;  %v55_v3 = vsel %vm51_vm0, %v50_v1, 0.0  ;;  %v93_v14 = vld [vmem:[%s4265_s2] sm:$0xff]  ;;  %v94_v15 = vld [vmem:[%s4265_s2 + $0x8] sm:$0xff]  ;;  %v79_v22 = vlaneseq }
   0x3   :  { %53 = vadd.xlane.f32.xlu0 %v52_v2  ;;  %v95_v16 = vld [vmem:[%s4265_s2 + $0x10] sm:$0xff]  ;;  %v3259_v17 = vpack.c.bf16 %v94_v15, %v93_v14  ;;  %v96_v18 = vld [vmem:[%s4265_s2 + $0x18] sm:$0xff]  ;;  %v48_v29 = vld [vmem:[%s4274_s11] sm:$0x3]  ;;  %vm191_vm1 = vcmask 64512   ;;  %s3641_s27 = smov 96  }
   0x4   :  { %v3263_v19 = vpack.c.bf16 %v96_v18, %v95_v16  ;;  %v3756_v26 = vshrl.u32 %v79_v22, 7  ;;  %v2808_v41 = vld [vmem:[%s4266_s3] ss:$0 sm:$0xff]  ;;  %s3642_s28 = smov 88   ;;  %s3643_s29 = smov 120   ;;  %vm3800_vm2 = vmpackc.low %vm191_vm1, %vm191_vm1  ;;  %v3818_v54 = vld [vmem:[%s4264_s1 + $0x8] sm:$0xff] }
   0x5   :  { %3260 = vmatprep.subr.bf16.mxu0 %v3259_v17  ;;  %v3813_v52 = vld [vmem:[%s4264_s1] sm:$0xff]  ;;  %vm275_vm3 = vcmask 130048   ;;  %s3644_s17 = smov 64   ;;  %s3645_s18 = smov 56   ;;  %vm1013_vm4 = vcmask 195584   ;;  %vm1274_vm5 = vcmask 523264  }
   0x6   :  { %3262 = vmatpush3.bf16.msra.mxu0 %v3259_v17  ;;  %v3759_v28 = vsub.s32 0, %v3756_v26  ;;  %v3765_v30 = vsub.s32 1, %v3756_v26  ;;  %s3646_s19 = smov 112   ;;  %s3647_s20 = smov 80   ;;  %vm3656_vm6 = vmmov 0   ;;  %vm2707_vm7 = vcmask 1040384  }
   0x7   :  { %56 = vadd.xlane.f32.xlu0 %v55_v3  ;;  %3264 = vmatprep.subr.bf16.mxu0 %v3263_v19  ;;  %s3648_s21 = smov 48   ;;  %s3649_s22 = smov 104  }
   0x8   :  { %v82_v31 = vrot.slane %v48_v29, %v3759_v28  ;;  %v88_v34 = vrot.slane %v48_v29, %v3765_v30  ;;  %s3650_s23 = smov 72   ;;  %s4282_s24 = smov 40  }
   0x9   :  { %s4280_s25 = smov 8   ;;  %s4278_s11 = smov 16  }
   0xa   :  { %3266 = vmatpush3.bf16.msra.mxu0 %v3263_v19  ;;  %s4283_s26 = smov 24  }
  0x90   :  { %v54_v4 = vpop.xlane.xlu0 %53 }
  0x91   :  { %v59_v5 = vmul.f32 0.03125, %v54_v4 }
  0x93   :  { %v61_v6 = vsub.f32 %v49_v0, %v59_v5 }
  0x94   :  { %v57_v7 = vpop.xlane.xlu0 %56 }
  0x95   :  { %v60_v8 = vmul.f32 0.03125, %v57_v7  ;;  %v63_v9 = vmul.f32 %v61_v6, %v61_v6 }
  0x97   :  { %v62_v10 = vsub.f32 %v50_v1, %v60_v8  ;;  %v65_v11 = vsel %vm51_vm0, %v63_v9, 0.0 }
  0x98   :  { %66 = vadd.xlane.f32.xlu1 %v65_v11 }
  0x99   :  { %v64_v12 = vmul.f32 %v62_v10, %v62_v10 }
  0x9b   :  { %v68_v13 = vsel %vm51_vm0, %v64_v12, 0.0 }
  0x9c   :  { %69 = vadd.xlane.f32.xlu1 %v68_v13 }
 0x125   :  { %v67_v20 = vpop.xlane.xlu1 %66 }
 0x126   :  { %v71_v21 = vmul.f32 0.03125, %v67_v20 }
 0x128   :  { %v73_v23 = vadd.f32 1e-12, %v71_v21 }
 0x129   :  { %v70_v24 = vpop.xlane.xlu1 %69 }
 0x12a   :  { %3523 = vrsqrt.f32 %v73_v23  ;;  %v72_v25 = vmul.f32 0.03125, %v70_v24 }
 0x12c   :  { %v74_v27 = vadd.f32 1e-12, %v72_v25 }
 0x12e   :  { %3525 = vrsqrt.f32 %v74_v27 }
 0x134   :  { %v3524_v32 = vpop.eup %3523 }
 0x135   :  { %v77_v33 = vmul.f32 %v3524_v32, %v61_v6 }
 0x137   :  { %v83_v35 = vmul.f32 %v82_v31, %v77_v33 }
 0x138   :  { %v3526_v36 = vpop.eup %3525 }
 0x139   :  { %v78_v37 = vmul.f32 %v3526_v36, %v62_v10  ;;  %v3769_v38 = vadd.f32 %v88_v34, %v83_v35 }
 0x13b   :  { %v84_v39 = vmul.f32 %v82_v31, %v78_v37  ;;  %3040 = vmatprep.mubr.msk.f32.mxu0 %vm51_vm0, %v3769_v38 }
 0x13d   :  { %v3773_v40 = vadd.f32 %v88_v34, %v84_v39 }
 0x13f   :  { %3041 = vmatmul.mubr.msk.f32.vlgmr.msra.gmra.mrb[0].mxu0 %vm51_vm0, %v3773_v40 }
 0x212   :  { %v3042_v42 = vpop.f32.mrb[0].mxu0 }
 0x213   :  { %v3780_v43 = vadd.f32 %v3042_v42, %v2808_v41  ;;  %v176_v44 = vpop.f32.mrb[1].mxu0 }
 0x214   :  { %v3782_v45 = vadd.f32 %v2808_v41, %v176_v44 }
 0x216   :  { %3047 = vmatprep.mubr.msk.f32.mxu1 %vm191_vm1, %v3782_v45  ;;  %v3788_v46 = vpack.i.bf16 %v3780_v43, %v3782_v45 }
 0x218   :  { %3444 = vrot.lane.b32.xlu0 %v3788_v46, %s3641_s27 }
 0x21c   :  { %3454 = vrot.lane.b32.xlu0 %v3788_v46, %s3642_s28 }
 0x220   :  { %385 = vrot.lane.b32.xlu0 %v3782_v45, %s3643_s29 }
 0x224   :  { %387 = vrot.lane.b32.xlu0 %v3780_v43, %s3643_s29 }
 0x28a   :  { %v3445_v47 = vpop.permute.xlu0 %3444 }
 0x28b   :  { %v3447_v48 = vunpack.i.h.bf16 %v3445_v47  ;;  %v3446_v49 = vunpack.i.l.bf16 %v3445_v47 }
 0x28d   :  { %v3267_v51 = vpack.c.bf16 %v3447_v48, %v3446_v49 }
 0x28e   :  { %v3455_v8 = vpop.permute.xlu0 %3454 }
 0x28f   :  { %3269 = vmatprep.subr.msk.bf16.mxu1 %vm3800_vm2, %v3267_v51  ;;  %v3457_v10 = vunpack.i.h.bf16 %v3455_v8  ;;  %v3456_v11 = vunpack.i.l.bf16 %v3455_v8 }
 0x290   :  { %3272 = vmatpush3.bf16.xpose.msk.msra.mxu1 %vm3800_vm2, %v3267_v51 }
 0x291   :  { %v3277_v15 = vpack.c.bf16 %v3457_v10, %v3456_v11 }
 0x292   :  { %v386_v20 = vpop.permute.xlu0 %385 }
 0x296   :  { %v388_v21 = vpop.permute.xlu0 %387 }
 0x297   :  { %3048 = vmatmul.mubr.msk.f32.vlgmr.msra.gmra.mrb[0].mxu1 %vm191_vm1, %v3780_v43 }
 0x36a   :  { %v3049_v53 = vpop.f32.mrb[0].mxu1 }
 0x36b   :  { %v266_v55 = vpop.f32.mrb[1].mxu1  ;;  %v272_v57 = vadd.f32 %v3049_v53, %v3818_v54 }
 0x36c   :  { %v267_v56 = vadd.f32 %v266_v55, %v3813_v52 }
 0x36d   :  { %v279_v59 = vsel %vm275_vm3, %v272_v57, -inf }
 0x36e   :  { %v276_v58 = vsel %vm275_vm3, %v267_v56, -inf }
 0x36f   :  { %277 = vmax.xlane.f32.xlu1 %v276_v58 }
 0x373   :  { %280 = vmax.xlane.f32.xlu1 %v279_v59 }
 0x3fc   :  { %v278_v60 = vpop.xlane.xlu1 %277 }
 0x3fd   :  { %v282_v61 = vsub.f32 %v267_v56, %v278_v60 }
 0x3ff   :  { %v284_v0 = vmul.f32 1.442695, %v282_v61 }
 0x400   :  { %v281_v62 = vpop.xlane.xlu1 %280 }
 0x401   :  { %v283_v63 = vsub.f32 %v272_v57, %v281_v62 }
 0x403   :  { %v286_v1 = vmul.f32 1.442695, %v283_v63 }
 0x405   :  { %3527 = vpow2.f32 %v286_v1 }
 0x406   :  { %3529 = vpow2.f32 %v284_v0 }
 0x40f   :  { %v3528_v2 = vpop.eup %3527 }
 0x410   :  { %v291_v3 = vsel %vm275_vm3, %v3528_v2, 0.0  ;;  %v3530_v4 = vpop.eup %3529 }
 0x411   :  { %292 = vadd.xlane.f32.xlu1 %v291_v3  ;;  %v288_v5 = vsel %vm275_vm3, %v3530_v4, 0.0 }
 0x415   :  { %289 = vadd.xlane.f32.xlu1 %v288_v5 }
 0x426   :  { %3449 = vrot.lane.b32.xlu1 %v3788_v46, %s3644_s17 }
 0x49e   :  { %v293_v6 = vpop.xlane.xlu1 %292 }
 0x49f   :  { %3531 = vrcp.f32 %v293_v6 }
 0x4a2   :  { %v290_v7 = vpop.xlane.xlu1 %289 }
 0x4a3   :  { %3533 = vrcp.f32 %v290_v7 }
 0x4a6   :  { %v3450_v9 = vpop.permute.xlu1 %3449 }
 0x4a7   :  { %v3452_v12 = vunpack.i.h.bf16 %v3450_v9  ;;  %v3451_v13 = vunpack.i.l.bf16 %v3450_v9 }
 0x4a9   :  { %v3273_v14 = vpack.c.bf16 %v3452_v12, %v3451_v13  ;;  %v3532_v16 = vpop.eup %3531 }
 0x4aa   :  { %v297_v19 = vmul.f32 %v3532_v16, %v3528_v2 }
 0x4ab   :  { %3274 = vmatprep.subr.bf16.mxu1 %v3273_v14 }
 0x4ac   :  { %3276 = vmatpush3.bf16.msra.mxu1 %v3273_v14 }
 0x4ad   :  { %v3534_v17 = vpop.eup %3533  ;;  %3279 = vmatprep.subr.msk.bf16.mxu1 %vm3800_vm2, %v3277_v15 }
 0x4ae   :  { %v296_v18 = vmul.f32 %v3534_v17, %v3530_v4 }
 0x4b0   :  { %3054 = vmatprep.mubr.msk.f32.mxu1 %vm275_vm3, %v296_v18 }
 0x4b1   :  { %3055 = vmatmul.mubr.msk.f32.vlgmr.msra.gmra.mrb[2].mxu1 %vm275_vm3, %v297_v19 }
 0x4b2   :  { %3061 = vmatprep.mubr.msk.f32.mxu1 %vm191_vm1, %v386_v20 }
 0x4b5   :  { %3282 = vmatpush3.bf16.xpose.msk.msra.mxu1 %vm3800_vm2, %v3277_v15 }
 0x4bc   :  { %3062 = vmatmul.mubr.msk.f32.vlgmr.msra.gmra.mrb[4].mxu1 %vm191_vm1, %v388_v21 }
 0x584   :  { %v3836_v22 = vpop.f32.mrb[2].mxu1 }
 0x585   :  { %v3838_v23 = vpop.f32.mrb[3].mxu1 }
 0x58f   :  { %v3063_v24 = vpop.f32.mrb[4].mxu1 }
 0x590   :  { %v473_v25 = vadd.f32 %v3063_v24, %v3818_v54  ;;  %v467_v27 = vpop.f32.mrb[5].mxu1 }
 0x591   :  { %v468_v29 = vadd.f32 %v467_v27, %v3813_v52 }
 0x592   :  { %v479_v31 = vsel %vm275_vm3, %v473_v25, -inf }
 0x593   :  { %480 = vmax.xlane.f32.xlu0 %v479_v31  ;;  %v476_v32 = vsel %vm275_vm3, %v468_v29, -inf }
 0x594   :  { %477 = vmax.xlane.f32.xlu1 %v476_v32 }
 0x5a5   :  { %3459 = vrot.lane.b32.xlu1 %v3788_v46, %s3645_s18 }
 0x5a9   :  { %585 = vrot.lane.b32.xlu1 %v3782_v45, %s3646_s19 }
 0x5ad   :  { %587 = vrot.lane.b32.xlu1 %v3780_v43, %s3646_s19 }
 0x620   :  { %v481_v33 = vpop.xlane.xlu0 %480 }
 0x621   :  { %v483_v34 = vsub.f32 %v473_v25, %v481_v33  ;;  %v478_v35 = vpop.xlane.xlu1 %477 }
 0x622   :  { %v482_v36 = vsub.f32 %v468_v29, %v478_v35 }
 0x623   :  { %v486_v37 = vmul.f32 1.442695, %v483_v34 }
 0x624   :  { %v484_v39 = vmul.f32 1.442695, %v482_v36 }
 0x625   :  { %3535 = vpow2.f32 %v486_v37  ;;  %v3460_v41 = vpop.permute.xlu1 %3459 }
 0x626   :  { %v3462_v42 = vunpack.i.h.bf16 %v3460_v41  ;;  %v3461_v44 = vunpack.i.l.bf16 %v3460_v41  ;;  %3537 = vpow2.f32 %v484_v39 }
 0x628   :  { %v3283_v47 = vpack.c.bf16 %v3462_v42, %v3461_v44 }
 0x629   :  { %v586_v1 = vpop.permute.xlu1 %585 }
 0x62a   :  { %3284 = vmatprep.subr.bf16.mxu0 %v3283_v47 }
 0x62b   :  { %3286 = vmatpush3.bf16.msra.mxu0 %v3283_v47 }
 0x62d   :  { %v588_v2 = vpop.permute.xlu1 %587 }
 0x62f   :  { %v3536_v48 = vpop.eup %3535 }
 0x630   :  { %v491_v49 = vsel %vm275_vm3, %v3536_v48, 0.0  ;;  %v3538_v51 = vpop.eup %3537 }
 0x631   :  { %492 = vadd.xlane.f32.xlu0 %v491_v49  ;;  %v488_v53 = vsel %vm275_vm3, %v3538_v51, 0.0 }
 0x635   :  { %489 = vadd.xlane.f32.xlu0 %v488_v53 }
 0x64b   :  { %3464 = vrot.lane.b32.xlu0 %v3788_v46, %s3647_s20 }
 0x6be   :  { %v493_v55 = vpop.xlane.xlu0 %492 }
 0x6bf   :  { %3539 = vrcp.f32 %v493_v55 }
 0x6c2   :  { %v490_v56 = vpop.xlane.xlu0 %489 }
 0x6c3   :  { %3541 = vrcp.f32 %v490_v56 }
 0x6c6   :  { %v3465_v57 = vpop.permute.xlu0 %3464 }
 0x6c7   :  { %v3467_v58 = vunpack.i.h.bf16 %v3465_v57  ;;  %v3466_v59 = vunpack.i.l.bf16 %v3465_v57 }
 0x6c9   :  { %v3287_v60 = vpack.c.bf16 %v3467_v58, %v3466_v59  ;;  %v3540_v61 = vpop.eup %3539 }
 0x6ca   :  { %v497_v0 = vmul.f32 %v3540_v61, %v3536_v48 }
 0x6cb   :  { %3289 = vmatprep.subr.msk.bf16.mxu0 %vm3800_vm2, %v3287_v60 }
 0x6cd   :  { %v3542_v62 = vpop.eup %3541 }
 0x6ce   :  { %v496_v63 = vmul.f32 %v3542_v62, %v3538_v51 }
 0x6d0   :  { %3068 = vmatprep.mubr.msk.f32.mxu0 %vm275_vm3, %v496_v63 }
 0x6d1   :  { %3069 = vmatmul.mubr.msk.f32.vlgmr.msra.gmra.mrb[2].mxu0 %vm275_vm3, %v497_v0 }
 0x6d2   :  { %3292 = vmatpush3.bf16.xpose.msk.msra.mxu0 %vm3800_vm2, %v3287_v60  ;;  %3075 = vmatprep.mubr.msk.f32.mxu0 %vm191_vm1, %v586_v1 }
 0x6d9   :  { %3076 = vmatmul.mubr.msk.f32.vlgmr.msra.gmra.mrb[4].mxu0 %vm191_vm1, %v588_v2 }
 0x7a4   :  { %v3862_v3 = vpop.f32.mrb[2].mxu0 }
 0x7a5   :  { %v3864_v4 = vpop.f32.mrb[3].mxu0 }
 0x7ac   :  { %v3077_v5 = vpop.f32.mrb[4].mxu0 }
 0x7ad   :  { %v673_v6 = vadd.f32 %v3077_v5, %v3818_v54  ;;  %v667_v7 = vpop.f32.mrb[5].mxu0 }
 0x7ae   :  { %v668_v8 = vadd.f32 %v667_v7, %v3813_v52 }
 0x7af   :  { %v679_v9 = vsel %vm275_vm3, %v673_v6, -inf }
 0x7b0   :  { %680 = vmax.xlane.f32.xlu0 %v679_v9  ;;  %v676_v10 = vsel %vm275_vm3, %v668_v8, -inf }
 0x7b1   :  { %677 = vmax.xlane.f32.xlu1 %v676_v10 }
 0x7c2   :  { %3469 = vrot.lane.b32.xlu1 %v3788_v46, %s3648_s21 }
 0x7c6   :  { %785 = vrot.lane.b32.xlu1 %v3782_v45, %s3649_s22 }
 0x7ca   :  { %787 = vrot.lane.b32.xlu1 %v3780_v43, %s3649_s22 }
 0x83d   :  { %v681_v11 = vpop.xlane.xlu0 %680 }
 0x83e   :  { %v683_v12 = vsub.f32 %v673_v6, %v681_v11  ;;  %v678_v13 = vpop.xlane.xlu1 %677 }
 0x83f   :  { %v682_v14 = vsub.f32 %v668_v8, %v678_v13  ;;  %v1018_v13 = vld [vmem:[%s4267_s4 + $0x10] sm:$0xff] }
 0x840   :  { %v686_v15 = vmul.f32 1.442695, %v683_v12  ;;  %v1016_v12 = vld [vmem:[%s4267_s4] sm:$0xff] }
 0x841   :  { %v684_v16 = vmul.f32 1.442695, %v682_v14 }
 0x842   :  { %3543 = vpow2.f32 %v686_v15  ;;  %v3470_v17 = vpop.permute.xlu1 %3469  ;;  %v1019_v15 = vld [vmem:[%s4267_s4 + $0x18] sm:$0xff] }
 0x843   :  { %v3472_v18 = vunpack.i.h.bf16 %v3470_v17  ;;  %v3471_v19 = vunpack.i.l.bf16 %v3470_v17  ;;  %3545 = vpow2.f32 %v684_v16  ;;  %v3311_v16 = vpack.c.bf16 %v1019_v15, %v1018_v13  ;;  %v1259_v15 = vld [vmem:[%s4272_s9] sm:$0xff] }
 0x845   :  { %v3293_v20 = vpack.c.bf16 %v3472_v18, %v3471_v19 }
 0x846   :  { %v786_v39 = vpop.permute.xlu1 %785 }
 0x847   :  { %3294 = vmatprep.subr.bf16.mxu1 %v3293_v20 }
 0x848   :  { %3296 = vmatpush3.bf16.msra.mxu1 %v3293_v20 }
 0x84a   :  { %v788_v41 = vpop.permute.xlu1 %787 }
 0x84c   :  { %v3544_v21 = vpop.eup %3543 }
 0x84d   :  { %v691_v45 = vsel %vm275_vm3, %v3544_v21, 0.0  ;;  %v3546_v24 = vpop.eup %3545 }
 0x84e   :  { %692 = vadd.xlane.f32.xlu0 %v691_v45  ;;  %v688_v43 = vsel %vm275_vm3, %v3546_v24, 0.0 }
 0x852   :  { %689 = vadd.xlane.f32.xlu0 %v688_v43 }
 0x868   :  { %3474 = vrot.lane.b32.xlu0 %v3788_v46, %s3650_s23 }
 0x8db   :  { %v693_v25 = vpop.xlane.xlu0 %692 }
 0x8dc   :  { %3547 = vrcp.f32 %v693_v25 }
 0x8df   :  { %v690_v27 = vpop.xlane.xlu0 %689 }
 0x8e0   :  { %3549 = vrcp.f32 %v690_v27 }
 0x8e3   :  { %v3475_v29 = vpop.permute.xlu0 %3474 }
 0x8e4   :  { %v3477_v31 = vunpack.i.h.bf16 %v3475_v29  ;;  %v3476_v32 = vunpack.i.l.bf16 %v3475_v29 }
 0x8e6   :  { %v3297_v33 = vpack.c.bf16 %v3477_v31, %v3476_v32  ;;  %v3548_v34 = vpop.eup %3547 }
 0x8e7   :  { %v697_v37 = vmul.f32 %v3548_v34, %v3544_v21 }
 0x8e8   :  { %3299 = vmatprep.subr.msk.bf16.mxu1 %vm3800_vm2, %v3297_v33 }
 0x8ea   :  { %v3550_v35 = vpop.eup %3549 }
 0x8eb   :  { %v696_v36 = vmul.f32 %v3550_v35, %v3546_v24 }
 0x8ed   :  { %3082 = vmatprep.mubr.msk.f32.mxu1 %vm275_vm3, %v696_v36 }
 0x8ee   :  { %3083 = vmatmul.mubr.msk.f32.vlgmr.msra.gmra.mrb[6].mxu1 %vm275_vm3, %v697_v37 }
 0x8ef   :  { %3302 = vmatpush3.bf16.xpose.msk.msra.mxu1 %vm3800_vm2, %v3297_v33  ;;  %3089 = vmatprep.mubr.msk.f32.mxu1 %vm191_vm1, %v786_v39 }
 0x8f6   :  { %3090 = vmatmul.mubr.msk.f32.vlgmr.msra.gmra.mrb[8].mxu1 %vm191_vm1, %v788_v41 }
 0x9c1   :  { %v3084_v42 = vpop.f32.mrb[6].mxu1 }
 0x9c2   :  { %v776_v44 = vpop.f32.mrb[7].mxu1 }
 0x9c9   :  { %v3091_v47 = vpop.f32.mrb[8].mxu1 }
 0x9ca   :  { %v873_v48 = vadd.f32 %v3091_v47, %v3818_v54  ;;  %v867_v49 = vpop.f32.mrb[9].mxu1 }
 0x9cb   :  { %v868_v51 = vadd.f32 %v867_v49, %v3813_v52 }
 0x9cc   :  { %v879_v53 = vsel %vm275_vm3, %v873_v48, -inf }
 0x9cd   :  { %880 = vmax.xlane.f32.xlu0 %v879_v53  ;;  %v876_v55 = vsel %vm275_vm3, %v868_v51, -inf }
 0x9ce   :  { %877 = vmax.xlane.f32.xlu1 %v876_v55 }
 0x9df   :  { %3479 = vrot.lane.b32.xlu1 %v3788_v46, %s4282_s24 }
 0x9e3   :  { %989 = vrot.lane.b32.xlu1 %v3862_v3, %s4280_s25 }
 0x9e7   :  { %995 = vrot.lane.b32.xlu1 %v776_v44, %s4278_s11 }
 0x9eb   :  { %997 = vrot.lane.b32.xlu1 %v3084_v42, %s4278_s11 }
 0xa5a   :  { %v881_v56 = vpop.xlane.xlu0 %880 }
 0xa5b   :  { %v883_v57 = vsub.f32 %v873_v48, %v881_v56  ;;  %v878_v58 = vpop.xlane.xlu1 %877 }
 0xa5c   :  { %v882_v59 = vsub.f32 %v868_v51, %v878_v58  ;;  %v1150_v58 = vld [vmem:[%s4270_s7 + $0x8] sm:$0xff] }
 0xa5d   :  { %v886_v60 = vmul.f32 1.442695, %v883_v57 }
 0xa5e   :  { %v884_v61 = vmul.f32 1.442695, %v882_v59 }
 0xa5f   :  { %v3480_v62 = vpop.permute.xlu1 %3479 }
 0xa60   :  { %3551 = vpow2.f32 %v884_v61  ;;  %v3482_v63 = vunpack.i.h.bf16 %v3480_v62  ;;  %v3481_v0 = vunpack.i.l.bf16 %v3480_v62  ;;  %v1152_v61 = vld [vmem:[%s4270_s7 + $0x18] sm:$0xff] }
 0xa61   :  { %3553 = vpow2.f32 %v886_v60  ;;  %v1151_v60 = vld [vmem:[%s4270_s7 + $0x10] sm:$0xff] }
 0xa62   :  { %v3303_v46 = vpack.c.bf16 %v3482_v63, %v3481_v0  ;;  %v3319_v62 = vpack.c.bf16 %v1152_v61, %v1151_v60 }
 0xa63   :  { %v990_v19 = vpop.permute.xlu1 %989 }
 0xa64   :  { %3304 = vmatprep.subr.bf16.mxu0 %v3303_v46  ;;  %v1010_v25 = vsel %vm191_vm1, %v3836_v22, %v990_v19  ;;  %v1262_v19 = vld [vmem:[%s4272_s9 + $0x18] sm:$0xff] }
 0xa65   :  { %3306 = vmatpush3.bf16.msra.mxu0 %v3303_v46 }
 0xa67   :  { %v996_v20 = vpop.permute.xlu1 %995 }
 0xa6a   :  { %v3552_v1 = vpop.eup %3551 }
 0xa6b   :  { %v888_v2 = vsel %vm275_vm3, %v3552_v1, 0.0  ;;  %v3554_v3 = vpop.eup %3553  ;;  %v998_v45 = vpop.permute.xlu1 %997 }
 0xa6c   :  { %889 = vadd.xlane.f32.xlu0 %v888_v2  ;;  %v891_v5 = vsel %vm275_vm3, %v3554_v3, 0.0  ;;  %v1012_v31 = vsel %vm275_vm3, %v1010_v25, %v998_v45  ;;  %v1264_v45 = vld [vmem:[%s4272_s9 + $0x28] sm:$0xff]  ;;  %v1266_v25 = vld [vmem:[%s4272_s9 + $0x38] sm:$0xff] }
 0xa70   :  { %892 = vadd.xlane.f32.xlu0 %v891_v5  ;;  %v3952_v5 = vld [vmem:[%s4269_s6] sm:$0xf] }
 0xa86   :  { %987 = vrot.lane.b32.xlu0 %v3864_v4, %s4280_s25  ;;  %v1017_v4 = vld [vmem:[%s4267_s4 + $0x8] sm:$0xff] }
 0xa87   :  { %v3307_v14 = vpack.c.bf16 %v1017_v4, %v1016_v12 }
 0xa89   :  { %3308 = vmatprep.subr.bf16.mxu0 %v3307_v14 }
 0xaf9   :  { %v890_v6 = vpop.xlane.xlu0 %889 }
 0xafa   :  { %3555 = vrcp.f32 %v890_v6  ;;  %v1140_v6 = vrot.slane %v3952_v5, %v3759_v28 }
 0xafd   :  { %v893_v7 = vpop.xlane.xlu0 %892 }
 0xafe   :  { %3557 = vrcp.f32 %v893_v7 }
 0xb01   :  { %v988_v21 = vpop.permute.xlu0 %987 }
 0xb02   :  { %v1009_v24 = vsel %vm191_vm1, %v3838_v23, %v988_v21  ;;  %v2835_v23 = vld [vmem:[%s4268_s5] ss:$0 sm:$0xff] }
 0xb03   :  { %v1011_v27 = vsel %vm275_vm3, %v1009_v24, %v996_v20  ;;  %v1263_v21 = vld [vmem:[%s4272_s9 + $0x20] sm:$0xff] }
 0xb04   :  { %v3556_v8 = vpop.eup %3555  ;;  %v3331_v24 = vpack.c.bf16 %v1264_v45, %v1263_v21 }
 0xb05   :  { %v896_v9 = vmul.f32 %v3556_v8, %v3552_v1 }
 0xb07   :  { %3096 = vmatprep.mubr.msk.f32.mxu0 %vm275_vm3, %v896_v9  ;;  %v1146_v9 = vrot.slane %v3952_v5, %v3765_v30 }
 0xb08   :  { %v3558_v10 = vpop.eup %3557 }
 0xb09   :  { %v897_v11 = vmul.f32 %v3558_v10, %v3554_v3 }
 0xb0b   :  { %3097 = vmatmul.mubr.msk.f32.vlgmr.msra.gmra.mrb[6].mxu0 %vm275_vm3, %v897_v11 }
 0xb0c   :  { %3310 = vmatpush3.bf16.msra.mxu0 %v3307_v14 }
 0xb0d   :  { %3312 = vmatprep.subr.bf16.mxu0 %v3311_v16 }
 0xb10   :  { %3314 = vmatpush3.bf16.msra.mxu0 %v3311_v16  ;;  %v1260_v16 = vld [vmem:[%s4272_s9 + $0x8] sm:$0xff] }
 0xbde   :  { %v3098_v17 = vpop.f32.mrb[6].mxu0 }
 0xbdf   :  { %1005 = vrot.lane.b32.xlu1 %v3098_v17, %s4283_s26  ;;  %v976_v18 = vpop.f32.mrb[7].mxu0  ;;  %v3323_v17 = vpack.c.bf16 %v1260_v16, %v1259_v15  ;;  %v2846_v15 = vld [vmem:[%s4265_s2 + $0x30] sm:$0xff]  ;;  %v2847_v16 = vld [vmem:[%s4265_s2 + $0x38] sm:$0xff] }
 0xbe0   :  { %1003 = vrot.lane.b32.xlu0 %v976_v18, %s4283_s26  ;;  %v1261_v18 = vld [vmem:[%s4272_s9 + $0x10] sm:$0xff]  ;;  %s4290_s26 = smov 24  }
 0xbe1   :  { %3324 = vmatprep.subr.bf16.mxu0 %v3323_v17  ;;  %v3327_v20 = vpack.c.bf16 %v1262_v19, %v1261_v18 }
 0xc51   :  { %v1006_v43 = vpop.permute.xlu1 %1005 }
 0xc52   :  { %v1004_v29 = vpop.permute.xlu0 %1003  ;;  %v1015_v33 = vsel %vm1013_vm4, %v1012_v31, %v1006_v43  ;;  %v1265_v43 = vld [vmem:[%s4272_s9 + $0x30] sm:$0xff] }
 0xc53   :  { %v1014_v32 = vsel %vm1013_vm4, %v1011_v27, %v1004_v29  ;;  %v3335_v27 = vpack.c.bf16 %v1266_v25, %v1265_v43  ;;  %v2838_v29 = vld [vmem:[%s4271_s8] ss:$0 sm:$0xff]  ;;  %v1386_v43 = vsub.s32 2, %v3756_v26  ;;  %v1392_v25 = vsub.s32 3, %v3756_v26 }
 0xc54   :  { %3107 = vmatprep.mubr.msk.f32.mxu0 %vm51_vm0, %v1014_v32 }
 0xc55   :  { %3108 = vmatmul.mubr.msk.f32.vlgmr.msra.gmra.mrb[8].mxu0 %vm51_vm0, %v1015_v33 }
 0xc56   :  { %3326 = vmatpush3.bf16.msra.mxu0 %v3323_v17  ;;  %v3343_v17 = vpack.c.bf16 %v2847_v16, %v2846_v15 }
 0xc57   :  { %3328 = vmatprep.subr.bf16.mxu0 %v3327_v20 }
 0xc5a   :  { %3330 = vmatpush3.bf16.msra.mxu0 %v3327_v20 }
 0xc5b   :  { %3332 = vmatprep.subr.bf16.mxu0 %v3331_v24 }
 0xc5e   :  { %3334 = vmatpush3.bf16.msra.mxu0 %v3331_v24 }
 0xc5f   :  { %3336 = vmatprep.subr.bf16.mxu0 %v3335_v27 }
 0xc62   :  { %3338 = vmatpush3.bf16.msra.mxu0 %v3335_v27  ;;  %v1387_v27 = vrot.slane %v3952_v5, %v1386_v43 }
 0xd28   :  { %v3109_v34 = vpop.f32.mrb[8].mxu0 }
 0xd29   :  { %v1105_v35 = vadd.f32 %v3109_v34, %v2835_v23  ;;  %v1099_v22 = vpop.f32.mrb[9].mxu0 }
 0xd2a   :  { %v1100_v36 = vadd.f32 %v2835_v23, %v1099_v22 }
 0xd2b   :  { %v1110_v37 = vadd.f32 %v1105_v35, %v3773_v40 }
 0xd2c   :  { %v1109_v39 = vadd.f32 %v1100_v36, %v3769_v38  ;;  %v1149_v38 = vld [vmem:[%s4270_s7] sm:$0xff] }
 0xd2d   :  { %v1114_v41 = vsel %vm51_vm0, %v1110_v37, 0.0  ;;  %v3315_v59 = vpack.c.bf16 %v1150_v58, %v1149_v38  ;;  %v2841_v38 = vld [vmem:[%s4273_s10] ss:$0 sm:$0xff] }
 0xd2e   :  { %1115 = vadd.xlane.f32.xlu1 %v1114_v41  ;;  %v1111_v42 = vsel %vm51_vm0, %v1109_v39, 0.0 }
 0xd2f   :  { %1112 = vadd.xlane.f32.xlu0 %v1111_v42  ;;  %3316 = vmatprep.subr.bf16.mxu1 %v3315_v59 }
 0xd30   :  { %3318 = vmatpush3.bf16.msra.mxu1 %v3315_v59 }
 0xd31   :  { %3320 = vmatprep.subr.bf16.mxu1 %v3319_v62 }
 0xd34   :  { %3322 = vmatpush3.bf16.msra.mxu1 %v3319_v62 }
 0xdbb   :  { %v1116_v44 = vpop.xlane.xlu1 %1115 }
 0xdbc   :  { %v1118_v47 = vmul.f32 0.03125, %v1116_v44  ;;  %v1113_v48 = vpop.xlane.xlu0 %1112 }
 0xdbd   :  { %v1117_v49 = vmul.f32 0.03125, %v1113_v48 }
 0xdbe   :  { %v1120_v51 = vsub.f32 %v1110_v37, %v1118_v47 }
 0xdbf   :  { %v1119_v53 = vsub.f32 %v1109_v39, %v1117_v49 }
 0xdc0   :  { %v1122_v57 = vmul.f32 %v1120_v51, %v1120_v51 }
 0xdc1   :  { %v1121_v55 = vmul.f32 %v1119_v53, %v1119_v53 }
 0xdc2   :  { %v1126_v40 = vsel %vm51_vm0, %v1122_v57, 0.0 }
 0xdc3   :  { %v1123_v56 = vsel %vm51_vm0, %v1121_v55, 0.0 }
 0xdc4   :  { %1124 = vadd.xlane.f32.xlu0 %v1123_v56 }
 0xdc8   :  { %1127 = vadd.xlane.f32.xlu0 %v1126_v40 }
 0xe51   :  { %v1125_v63 = vpop.xlane.xlu0 %1124 }
 0xe52   :  { %v1129_v0 = vmul.f32 0.03125, %v1125_v63 }
 0xe54   :  { %v1131_v46 = vadd.f32 1e-12, %v1129_v0 }
 0xe55   :  { %v1128_v1 = vpop.xlane.xlu0 %1127 }
 0xe56   :  { %3559 = vrsqrt.f32 %v1131_v46  ;;  %v1130_v2 = vmul.f32 0.03125, %v1128_v1 }
 0xe58   :  { %v1132_v3 = vadd.f32 1e-12, %v1130_v2 }
 0xe5a   :  { %3561 = vrsqrt.f32 %v1132_v3 }
 0xe60   :  { %v3560_v7 = vpop.eup %3559 }
 0xe61   :  { %v1135_v8 = vmul.f32 %v3560_v7, %v1119_v53 }
 0xe63   :  { %v1141_v10 = vmul.f32 %v1140_v6, %v1135_v8 }
 0xe64   :  { %v3562_v11 = vpop.eup %3561 }
 0xe65   :  { %v1136_v12 = vmul.f32 %v3562_v11, %v1120_v51  ;;  %v1147_v4 = vadd.f32 %v1146_v9, %v1141_v10 }
 0xe67   :  { %v1142_v13 = vmul.f32 %v1140_v6, %v1136_v12  ;;  %3118 = vmatprep.mubr.msk.f32.mxu1 %vm51_vm0, %v1147_v4 }
 0xe69   :  { %v1148_v14 = vadd.f32 %v1146_v9, %v1142_v13  ;;  %v2845_v13 = vld [vmem:[%s4265_s2 + $0x28] sm:$0xff] }
 0xe6b   :  { %3119 = vmatmul.mubr.msk.f32.vlgmr.msra.gmra.mrb[10].mxu1 %vm51_vm0, %v1148_v14 }
 0xf3e   :  { %v3120_v31 = vpop.f32.mrb[10].mxu1 }
 0xf3f   :  { %v1238_v32 = vadd.f32 %v3120_v31, %v2838_v29  ;;  %v1232_v33 = vpop.f32.mrb[11].mxu1 }
 0xf40   :  { %v1233_v23 = vadd.f32 %v2838_v29, %v1232_v33 }
 0xf41   :  { %v1242_v34 = vmul.f32 %v1238_v32, %v1238_v32 }
 0xf42   :  { %v1241_v35 = vmul.f32 %v1233_v23, %v1233_v23 }
 0xf43   :  { %v1244_v22 = vmul.f32 %v1242_v34, %v1238_v32 }
 0xf44   :  { %v1243_v36 = vmul.f32 %v1241_v35, %v1233_v23 }
 0xf45   :  { %v1246_v37 = vmul.f32 0.044715, %v1244_v22 }
 0xf46   :  { %v1245_v39 = vmul.f32 0.044715, %v1243_v36 }
 0xf47   :  { %v1248_v41 = vadd.f32 %v1246_v37, %v1238_v32  ;;  %v2849_v37 = vld [vmem:[%s4266_s3 + $0x1] ss:$0 sm:$0xff] }
 0xf48   :  { %v1247_v42 = vadd.f32 %v1245_v39, %v1233_v23 }
 0xf49   :  { %v1250_v44 = vmul.f32 0.7978846, %v1248_v41 }
 0xf4a   :  { %v1249_v47 = vmul.f32 0.7978846, %v1247_v42 }
 0xf4b   :  { %3563 = vtanh.f32 %v1250_v44 }
 0xf4c   :  { %3565 = vtanh.f32 %v1249_v47 }
 0xf55   :  { %v3564_v48 = vpop.eup %3563 }
 0xf56   :  { %v3566_v49 = vpop.eup %3565  ;;  %v1254_v51 = vadd.f32 1.0, %v3564_v48 }
 0xf57   :  { %v1253_v53 = vadd.f32 1.0, %v3566_v49 }
 0xf58   :  { %v1256_v55 = vmul.f32 0.5, %v1254_v51 }
 0xf59   :  { %v1255_v56 = vmul.f32 0.5, %v1253_v53 }
 0xf5a   :  { %v1258_v40 = vmul.f32 %v1256_v55, %v1238_v32 }
 0xf5b   :  { %v1257_v57 = vmul.f32 %v1255_v56, %v1233_v23  ;;  %v1393_v23 = vrot.slane %v3952_v5, %v1392_v25 }
 0xf5d   :  { %3137 = vmatprep.mubr.msk.f32.mxu0 %vm1274_vm5, %v1257_v57 }
 0xf5e   :  { %3138 = vmatmul.mubr.msk.f32.vlgmr.msra.gmra.mrb[10].mxu0 %vm1274_vm5, %v1258_v40 }
0x1031   :  { %v3139_v58 = vpop.f32.mrb[10].mxu0 }
0x1032   :  { %v1353_v59 = vadd.f32 %v3139_v58, %v2841_v38  ;;  %v1347_v60 = vpop.f32.mrb[11].mxu0 }
0x1033   :  { %v1348_v61 = vadd.f32 %v2841_v38, %v1347_v60 }
0x1034   :  { %v1357_v62 = vadd.f32 %v1353_v59, %v1148_v14 }
0x1035   :  { %v1356_v63 = vadd.f32 %v1348_v61, %v1147_v4  ;;  %v2844_v4 = vld [vmem:[%s4265_s2 + $0x20] sm:$0xff] }
0x1036   :  { %v1361_v0 = vsel %vm51_vm0, %v1357_v62, 0.0  ;;  %v3339_v14 = vpack.c.bf16 %v2845_v13, %v2844_v4 }
0x1037   :  { %1362 = vadd.xlane.f32.xlu1 %v1361_v0  ;;  %v1358_v46 = vsel %vm51_vm0, %v1356_v63, 0.0 }
0x1038   :  { %1359 = vadd.xlane.f32.xlu0 %v1358_v46  ;;  %3340 = vmatprep.subr.bf16.mxu1 %v3339_v14 }
0x1039   :  { %3342 = vmatpush3.bf16.msra.mxu1 %v3339_v14 }
0x103a   :  { %3344 = vmatprep.subr.bf16.mxu1 %v3343_v17 }
0x103d   :  { %3346 = vmatpush3.bf16.msra.mxu1 %v3343_v17 }
0x10c4   :  { %v1363_v1 = vpop.xlane.xlu1 %1362 }
0x10c5   :  { %v1365_v2 = vmul.f32 0.03125, %v1363_v1  ;;  %v1360_v3 = vpop.xlane.xlu0 %1359 }
0x10c6   :  { %v1364_v6 = vmul.f32 0.03125, %v1360_v3 }
0x10c7   :  { %v1367_v7 = vsub.f32 %v1357_v62, %v1365_v2 }
0x10c8   :  { %v1366_v8 = vsub.f32 %v1356_v63, %v1364_v6 }
0x10c9   :  { %v1369_v9 = vmul.f32 %v1367_v7, %v1367_v7 }
0x10ca   :  { %v1368_v10 = vmul.f32 %v1366_v8, %v1366_v8 }
0x10cb   :  { %v1373_v11 = vsel %vm51_vm0, %v1369_v9, 0.0 }
0x10cc   :  { %1374 = vadd.xlane.f32.xlu1 %v1373_v11  ;;  %v1370_v12 = vsel %vm51_vm0, %v1368_v10, 0.0 }
0x10cd   :  { %1371 = vadd.xlane.f32.xlu0 %v1370_v12 }
0x1159   :  { %v1375_v18 = vpop.xlane.xlu1 %1374 }
0x115a   :  { %v1377_v19 = vmul.f32 0.03125, %v1375_v18  ;;  %v1372_v20 = vpop.xlane.xlu0 %1371 }
0x115b   :  { %v1376_v21 = vmul.f32 0.03125, %v1372_v20 }
0x115c   :  { %v1379_v45 = vadd.f32 1e-12, %v1377_v19 }
0x115d   :  { %v1378_v24 = vadd.f32 1e-12, %v1376_v21 }
0x115e   :  { %3567 = vrsqrt.f32 %v1379_v45 }
0x115f   :  { %3569 = vrsqrt.f32 %v1378_v24 }
0x1168   :  { %v3568_v29 = vpop.eup %3567 }
0x1169   :  { %v3570_v31 = vpop.eup %3569  ;;  %v1383_v32 = vmul.f32 %v3568_v29, %v1367_v7 }
0x116a   :  { %v1382_v33 = vmul.f32 %v3570_v31, %v1366_v8 }
0x116b   :  { %v1389_v34 = vmul.f32 %v1387_v27, %v1383_v32 }
0x116c   :  { %v1388_v35 = vmul.f32 %v1387_v27, %v1382_v33 }
0x116d   :  { %v4018_v36 = vadd.f32 %v1393_v23, %v1389_v34 }
0x116e   :  { %v4016_v22 = vadd.f32 %v1393_v23, %v1388_v35 }
0x1170   :  { %3148 = vmatprep.mubr.msk.f32.mxu1 %vm51_vm0, %v4016_v22 }
0x1171   :  { %3149 = vmatmul.mubr.msk.f32.vlgmr.msra.gmra.mrb[12].mxu1 %vm51_vm0, %v4018_v36 }
0x1244   :  { %v3150_v39 = vpop.f32.mrb[12].mxu1 }
0x1245   :  { %v4027_v41 = vadd.f32 %v3150_v39, %v2849_v37  ;;  %v1481_v5 = vpop.f32.mrb[13].mxu1 }
0x1246   :  { %v4029_v42 = vadd.f32 %v2849_v37, %v1481_v5 }
0x1248   :  { %3155 = vmatprep.mubr.msk.f32.mxu1 %vm191_vm1, %v4029_v42  ;;  %v4035_v44 = vpack.i.bf16 %v4027_v41, %v4029_v42 }
0x124a   :  { %3489 = vrot.lane.b32.xlu1 %v4035_v44, %s3642_s28  ;;  %3484 = vrot.lane.b32.xlu0 %v4035_v44, %s3641_s27 }
0x124e   :  { %1688 = vrot.lane.b32.xlu1 %v4029_v42, %s3643_s29 }
0x1252   :  { %1690 = vrot.lane.b32.xlu1 %v4027_v41, %s3643_s29 }
0x12bc   :  { %v3490_v47 = vpop.permute.xlu1 %3489  ;;  %v3485_v48 = vpop.permute.xlu0 %3484 }
0x12bd   :  { %v3492_v49 = vunpack.i.h.bf16 %v3490_v47  ;;  %v3491_v51 = vunpack.i.l.bf16 %v3490_v47  ;;  %v3487_v53 = vunpack.i.h.bf16 %v3485_v48  ;;  %v3486_v55 = vunpack.i.l.bf16 %v3485_v48 }
0x12bf   :  { %v3347_v56 = vpack.c.bf16 %v3487_v53, %v3486_v55  ;;  %v3357_v57 = vpack.c.bf16 %v3492_v49, %v3491_v51 }
0x12c0   :  { %v1689_v40 = vpop.permute.xlu1 %1688 }
0x12c1   :  { %3349 = vmatprep.subr.msk.bf16.mxu1 %vm3800_vm2, %v3347_v56 }
0x12c2   :  { %3352 = vmatpush3.bf16.xpose.msk.msra.mxu1 %vm3800_vm2, %v3347_v56 }
0x12c3   :  { %3359 = vmatprep.subr.msk.bf16.mxu1 %vm3800_vm2, %v3357_v57 }
0x12c4   :  { %v1691_v38 = vpop.permute.xlu1 %1690 }
0x12c9   :  { %3156 = vmatmul.mubr.msk.f32.vlgmr.msra.gmra.mrb[14].mxu1 %vm191_vm1, %v4027_v41 }
0x12ca   :  { %3362 = vmatpush3.bf16.xpose.msk.msra.mxu1 %vm3800_vm2, %v3357_v57  ;;  %3169 = vmatprep.mubr.msk.f32.mxu1 %vm191_vm1, %v1689_v40 }
0x12d1   :  { %3170 = vmatmul.mubr.msk.f32.vlgmr.msra.gmra.mrb[16].mxu1 %vm191_vm1, %v1691_v38 }
0x139c   :  { %v3157_v58 = vpop.f32.mrb[14].mxu1 }
0x139d   :  { %v1576_v59 = vadd.f32 %v3157_v58, %v3818_v54  ;;  %v1570_v60 = vpop.f32.mrb[15].mxu1 }
0x139e   :  { %v1571_v61 = vadd.f32 %v1570_v60, %v3813_v52 }
0x139f   :  { %v1582_v62 = vsel %vm275_vm3, %v1576_v59, -inf }
0x13a0   :  { %1583 = vmax.xlane.f32.xlu1 %v1582_v62  ;;  %v1579_v63 = vsel %vm275_vm3, %v1571_v61, -inf }
0x13a1   :  { %1580 = vmax.xlane.f32.xlu0 %v1579_v63 }
0x13a4   :  { %v3171_v0 = vpop.f32.mrb[16].mxu1 }
0x13a5   :  { %v1770_v46 = vpop.f32.mrb[17].mxu1  ;;  %v1776_v2 = vadd.f32 %v3171_v0, %v3818_v54 }
0x13a6   :  { %v1771_v1 = vadd.f32 %v1770_v46, %v3813_v52 }
0x13a7   :  { %v1782_v6 = vsel %vm275_vm3, %v1776_v2, -inf }
0x13a8   :  { %v1779_v3 = vsel %vm275_vm3, %v1771_v1, -inf }
0x13a9   :  { %1780 = vmax.xlane.f32.xlu0 %v1779_v3  ;;  %v3615_v3 = vld [vmem:[%s4264_s1 + $0x8] sm:$0xff] }
0x13ad   :  { %1783 = vmax.xlane.f32.xlu0 %v1782_v6 }
0x142d   :  { %v1584_v7 = vpop.xlane.xlu1 %1583 }
0x142e   :  { %v1586_v8 = vsub.f32 %v1576_v59, %v1584_v7  ;;  %v1581_v9 = vpop.xlane.xlu0 %1580 }
0x142f   :  { %v1585_v10 = vsub.f32 %v1571_v61, %v1581_v9 }
0x1430   :  { %v1589_v11 = vmul.f32 1.442695, %v1586_v8  ;;  %v3616_v8 = vld [vmem:[%s4264_s1] sm:$0xff]  ;;  %s4287_s1 = smov 40  }
0x1431   :  { %v1587_v12 = vmul.f32 1.442695, %v1585_v10 }
0x1432   :  { %3571 = vpow2.f32 %v1589_v11 }
0x1433   :  { %3573 = vpow2.f32 %v1587_v12 }
0x1436   :  { %v1781_v4 = vpop.xlane.xlu0 %1780 }
0x1437   :  { %v1785_v13 = vsub.f32 %v1771_v1, %v1781_v4 }
0x1439   :  { %v1787_v14 = vmul.f32 1.442695, %v1785_v13 }
0x143a   :  { %v1784_v52 = vpop.xlane.xlu0 %1783 }
0x143b   :  { %3575 = vpow2.f32 %v1787_v14  ;;  %v1786_v54 = vsub.f32 %v1776_v2, %v1784_v52 }
0x143c   :  { %v3572_v15 = vpop.eup %3571 }
0x143d   :  { %v3574_v16 = vpop.eup %3573  ;;  %v1789_v17 = vmul.f32 1.442695, %v1786_v54  ;;  %v1594_v18 = vsel %vm275_vm3, %v3572_v15, 0.0 }
0x143e   :  { %1595 = vadd.xlane.f32.xlu1 %v1594_v18  ;;  %v1591_v19 = vsel %vm275_vm3, %v3574_v16, 0.0 }
0x143f   :  { %3577 = vpow2.f32 %v1789_v17  ;;  %1592 = vadd.xlane.f32.xlu0 %v1591_v19 }
0x1445   :  { %v3576_v20 = vpop.eup %3575 }
0x1446   :  { %v1791_v21 = vsel %vm275_vm3, %v3576_v20, 0.0 }
0x1447   :  { %1792 = vadd.xlane.f32.xlu0 %v1791_v21 }
0x1449   :  { %v3578_v45 = vpop.eup %3577 }
0x144a   :  { %v1794_v24 = vsel %vm275_vm3, %v3578_v45, 0.0 }
0x144b   :  { %1795 = vadd.xlane.f32.xlu1 %v1794_v24 }
0x145c   :  { %3499 = vrot.lane.b32.xlu1 %v4035_v44, %s3645_s18  ;;  %s4289_s18 = smov 16  }
0x145d   :  { %3494 = vrot.lane.b32.xlu0 %v4035_v44, %s3644_s17  ;;  %s4288_s17 = smov 8  }
0x1460   :  { %3504 = vrot.lane.b32.xlu1 %v4035_v44, %s3647_s20 }
0x1461   :  { %1890 = vrot.lane.b32.xlu0 %v4027_v41, %s3646_s19 }
0x1464   :  { %1888 = vrot.lane.b32.xlu1 %v4029_v42, %s3646_s19 }
0x14cb   :  { %v1596_v29 = vpop.xlane.xlu1 %1595 }
0x14cc   :  { %v1593_v27 = vpop.xlane.xlu0 %1592 }
0x14cd   :  { %3579 = vrcp.f32 %v1593_v27 }
0x14ce   :  { %3581 = vrcp.f32 %v1596_v29 }
0x14d4   :  { %v1793_v31 = vpop.xlane.xlu0 %1792 }
0x14d5   :  { %3583 = vrcp.f32 %v1793_v31 }
0x14d7   :  { %v3580_v32 = vpop.eup %3579 }
0x14d8   :  { %v1796_v33 = vpop.xlane.xlu1 %1795  ;;  %v3495_v23 = vpop.permute.xlu0 %3494  ;;  %v1599_v34 = vmul.f32 %v3580_v32, %v3574_v16 }
0x14d9   :  { %3585 = vrcp.f32 %v1796_v33  ;;  %v3497_v35 = vunpack.i.h.bf16 %v3495_v23  ;;  %v3496_v37 = vunpack.i.l.bf16 %v3495_v23  ;;  %v3582_v5 = vpop.eup %3581 }
0x14da   :  { %3162 = vmatprep.mubr.msk.f32.mxu0 %vm275_vm3, %v1599_v34  ;;  %v1600_v53 = vmul.f32 %v3582_v5, %v3572_v15 }
0x14db   :  { %v3353_v39 = vpack.c.bf16 %v3497_v35, %v3496_v37 }
0x14dc   :  { %v3500_v47 = vpop.permute.xlu1 %3499  ;;  %v1891_v62 = vpop.permute.xlu0 %1890 }
0x14dd   :  { %v3502_v48 = vunpack.i.h.bf16 %v3500_v47  ;;  %v3501_v49 = vunpack.i.l.bf16 %v3500_v47  ;;  %3354 = vmatprep.subr.bf16.mxu0 %v3353_v39 }
0x14de   :  { %3356 = vmatpush3.bf16.msra.mxu0 %v3353_v39 }
0x14df   :  { %v3584_v51 = vpop.eup %3583  ;;  %v3363_v55 = vpack.c.bf16 %v3502_v48, %v3501_v49 }
0x14e0   :  { %v3505_v56 = vpop.permute.xlu1 %3504  ;;  %v1799_v57 = vmul.f32 %v3584_v51, %v3576_v20 }
0x14e1   :  { %v3507_v40 = vunpack.i.h.bf16 %v3505_v56  ;;  %v3506_v38 = vunpack.i.l.bf16 %v3505_v56  ;;  %3163 = vmatmul.mubr.msk.f32.vlgmr.msra.gmra.mrb[12].mxu0 %vm275_vm3, %v1600_v53  ;;  %3364 = vmatprep.subr.bf16.mxu0 %v3363_v55 }
0x14e2   :  { %3366 = vmatpush3.bf16.msra.mxu0 %v3363_v55  ;;  %3176 = vmatprep.mubr.msk.f32.mxu0 %vm275_vm3, %v1799_v57 }
0x14e3   :  { %v3586_v58 = vpop.eup %3585  ;;  %v3367_v59 = vpack.c.bf16 %v3507_v40, %v3506_v38 }
0x14e4   :  { %v1800_v60 = vmul.f32 %v3586_v58, %v3578_v45  ;;  %v1889_v61 = vpop.permute.xlu1 %1888 }
0x14e5   :  { %3369 = vmatprep.subr.msk.bf16.mxu0 %vm3800_vm2, %v3367_v59 }
0x14e6   :  { %3177 = vmatmul.mubr.msk.f32.vlgmr.msra.gmra.mrb[14].mxu0 %vm275_vm3, %v1800_v60 }
0x14e7   :  { %3183 = vmatprep.mubr.msk.f32.mxu0 %vm191_vm1, %v1889_v61 }
0x14eb   :  { %3372 = vmatpush3.bf16.xpose.msk.msra.mxu0 %vm3800_vm2, %v3367_v59 }
0x14f2   :  { %3184 = vmatmul.mubr.msk.f32.vlgmr.msra.gmra.mrb[16].mxu0 %vm191_vm1, %v1891_v62 }
0x15b4   :  { %v4089_v63 = vpop.f32.mrb[12].mxu0 }
0x15b5   :  { %v4091_v0 = vpop.f32.mrb[13].mxu0 }
0x15b9   :  { %v4093_v46 = vpop.f32.mrb[14].mxu0 }
0x15ba   :  { %v4095_v1 = vpop.f32.mrb[15].mxu0 }
0x15c5   :  { %v3185_v2 = vpop.f32.mrb[16].mxu0 }
0x15c6   :  { %v1976_v6 = vadd.f32 %v3615_v3, %v3185_v2  ;;  %v1970_v7 = vpop.f32.mrb[17].mxu0 }
0x15c7   :  { %v1971_v9 = vadd.f32 %v3616_v8, %v1970_v7 }
0x15c8   :  { %v1982_v10 = vsel %vm275_vm3, %v1976_v6, -inf }
0x15c9   :  { %1983 = vmax.xlane.f32.xlu0 %v1982_v10  ;;  %v1979_v11 = vsel %vm275_vm3, %v1971_v9, -inf }
0x15ca   :  { %1980 = vmax.xlane.f32.xlu1 %v1979_v11 }
0x15db   :  { %3509 = vrot.lane.b32.xlu1 %v4035_v44, %s3648_s21 }
0x15df   :  { %2088 = vrot.lane.b32.xlu1 %v4029_v42, %s3649_s22 }
0x15e3   :  { %2090 = vrot.lane.b32.xlu1 %v4027_v41, %s3649_s22 }
0x1656   :  { %v1984_v12 = vpop.xlane.xlu0 %1983 }
0x1657   :  { %v1986_v4 = vsub.f32 %v1976_v6, %v1984_v12  ;;  %v1981_v13 = vpop.xlane.xlu1 %1980  ;;  %v2876_v12 = vld [vmem:[%s4267_s4 + $0x20] sm:$0xff] }
0x1658   :  { %v1985_v14 = vsub.f32 %v1971_v9, %v1981_v13 }
0x1659   :  { %v1989_v52 = vmul.f32 1.442695, %v1986_v4  ;;  %v2878_v4 = vld [vmem:[%s4267_s4 + $0x30] sm:$0xff] }
0x165a   :  { %v1987_v54 = vmul.f32 1.442695, %v1985_v14  ;;  %v2879_v14 = vld [vmem:[%s4267_s4 + $0x38] sm:$0xff] }
0x165b   :  { %3587 = vpow2.f32 %v1989_v52  ;;  %v3510_v15 = vpop.permute.xlu1 %3509  ;;  %v3391_v52 = vpack.c.bf16 %v2879_v14, %v2878_v4 }
0x165c   :  { %v3512_v16 = vunpack.i.h.bf16 %v3510_v15  ;;  %v3511_v17 = vunpack.i.l.bf16 %v3510_v15  ;;  %3589 = vpow2.f32 %v1987_v54 }
0x165e   :  { %v3373_v18 = vpack.c.bf16 %v3512_v16, %v3511_v17 }
0x165f   :  { %v2089_v35 = vpop.permute.xlu1 %2088 }
0x1660   :  { %3374 = vmatprep.subr.bf16.mxu1 %v3373_v18 }
0x1661   :  { %3376 = vmatpush3.bf16.msra.mxu1 %v3373_v18 }
0x1663   :  { %v2091_v37 = vpop.permute.xlu1 %2090 }
0x1665   :  { %v3588_v19 = vpop.eup %3587 }
0x1666   :  { %v1994_v42 = vsel %vm275_vm3, %v3588_v19, 0.0  ;;  %v3590_v20 = vpop.eup %3589 }
0x1667   :  { %1995 = vadd.xlane.f32.xlu0 %v1994_v42  ;;  %v1991_v41 = vsel %vm275_vm3, %v3590_v20, 0.0 }
0x166b   :  { %1992 = vadd.xlane.f32.xlu0 %v1991_v41 }
0x1681   :  { %3514 = vrot.lane.b32.xlu0 %v4035_v44, %s3650_s23 }
0x16f4   :  { %v1996_v21 = vpop.xlane.xlu0 %1995 }
0x16f5   :  { %3591 = vrcp.f32 %v1996_v21 }
0x16f8   :  { %v1993_v45 = vpop.xlane.xlu0 %1992 }
0x16f9   :  { %3593 = vrcp.f32 %v1993_v45 }
0x16fc   :  { %v3515_v24 = vpop.permute.xlu0 %3514 }
0x16fd   :  { %v3517_v27 = vunpack.i.h.bf16 %v3515_v24  ;;  %v3516_v29 = vunpack.i.l.bf16 %v3515_v24 }
0x16ff   :  { %v3377_v31 = vpack.c.bf16 %v3517_v27, %v3516_v29  ;;  %v3592_v32 = vpop.eup %3591 }
0x1700   :  { %v2000_v34 = vmul.f32 %v3592_v32, %v3588_v19 }
0x1701   :  { %3379 = vmatprep.subr.msk.bf16.mxu1 %vm3800_vm2, %v3377_v31 }
0x1703   :  { %v3594_v33 = vpop.eup %3593 }
0x1704   :  { %v1999_v23 = vmul.f32 %v3594_v33, %v3590_v20 }
0x1706   :  { %3190 = vmatprep.mubr.msk.f32.mxu1 %vm275_vm3, %v1999_v23 }
0x1707   :  { %3191 = vmatmul.mubr.msk.f32.vlgmr.msra.gmra.mrb[18].mxu1 %vm275_vm3, %v2000_v34 }
0x1708   :  { %3382 = vmatpush3.bf16.xpose.msk.msra.mxu1 %vm3800_vm2, %v3377_v31  ;;  %3197 = vmatprep.mubr.msk.f32.mxu1 %vm191_vm1, %v2089_v35 }
0x170f   :  { %3198 = vmatmul.mubr.msk.f32.vlgmr.msra.gmra.mrb[20].mxu1 %vm191_vm1, %v2091_v37 }
0x17da   :  { %v3192_v39 = vpop.f32.mrb[18].mxu1 }
0x17db   :  { %v2079_v5 = vpop.f32.mrb[19].mxu1 }
0x17e2   :  { %v3199_v47 = vpop.f32.mrb[20].mxu1 }
0x17e3   :  { %v2176_v48 = vadd.f32 %v3615_v3, %v3199_v47  ;;  %v2170_v49 = vpop.f32.mrb[21].mxu1 }
0x17e4   :  { %v2171_v51 = vadd.f32 %v3616_v8, %v2170_v49 }
0x17e5   :  { %v2182_v53 = vsel %vm275_vm3, %v2176_v48, -inf }
0x17e6   :  { %2183 = vmax.xlane.f32.xlu0 %v2182_v53  ;;  %v2179_v55 = vsel %vm275_vm3, %v2171_v51, -inf }
0x17e7   :  { %2180 = vmax.xlane.f32.xlu1 %v2179_v55 }
0x17f8   :  { %3519 = vrot.lane.b32.xlu1 %v4035_v44, %s4287_s1 }
0x17fc   :  { %2292 = vrot.lane.b32.xlu1 %v4093_v46, %s4288_s17 }
0x1800   :  { %2298 = vrot.lane.b32.xlu1 %v2079_v5, %s4289_s18 }
0x1804   :  { %2300 = vrot.lane.b32.xlu1 %v3192_v39, %s4289_s18 }
0x1873   :  { %v2184_v50 = vpop.xlane.xlu0 %2183 }
0x1874   :  { %v2186_v56 = vsub.f32 %v2176_v48, %v2184_v50  ;;  %v2181_v57 = vpop.xlane.xlu1 %2180 }
0x1875   :  { %v2185_v40 = vsub.f32 %v2171_v51, %v2181_v57 }
0x1876   :  { %v2189_v38 = vmul.f32 1.442695, %v2186_v56  ;;  %v2886_v56 = vld [vmem:[%s4270_s7 + $0x28] sm:$0xff] }
0x1877   :  { %v2187_v58 = vmul.f32 1.442695, %v2185_v40  ;;  %v2887_v40 = vld [vmem:[%s4270_s7 + $0x30] sm:$0xff] }
0x1878   :  { %v3520_v59 = vpop.permute.xlu1 %3519 }
0x1879   :  { %3595 = vpow2.f32 %v2187_v58  ;;  %v3522_v60 = vunpack.i.h.bf16 %v3520_v59  ;;  %v3521_v61 = vunpack.i.l.bf16 %v3520_v59 }
0x187a   :  { %3597 = vpow2.f32 %v2189_v38  ;;  %v2888_v38 = vld [vmem:[%s4270_s7 + $0x38] sm:$0xff] }
0x187b   :  { %v3383_v62 = vpack.c.bf16 %v3522_v60, %v3521_v61  ;;  %v3399_v58 = vpack.c.bf16 %v2888_v38, %v2887_v40 }
0x187c   :  { %v2293_v16 = vpop.permute.xlu1 %2292 }
0x187d   :  { %3384 = vmatprep.subr.bf16.mxu0 %v3383_v62  ;;  %v2313_v41 = vsel %vm191_vm1, %v4089_v63, %v2293_v16  ;;  %v2898_v16 = vld [vmem:[%s4272_s9 + $0x68] sm:$0xff] }
0x187e   :  { %3386 = vmatpush3.bf16.msra.mxu0 %v3383_v62 }
0x1880   :  { %v2299_v17 = vpop.permute.xlu1 %2298 }
0x1883   :  { %v3596_v44 = vpop.eup %3595 }
0x1884   :  { %v2191_v46 = vsel %vm275_vm3, %v3596_v44, 0.0  ;;  %v3598_v2 = vpop.eup %3597  ;;  %v2301_v19 = vpop.permute.xlu1 %2300 }
0x1885   :  { %2192 = vadd.xlane.f32.xlu0 %v2191_v46  ;;  %v2194_v3 = vsel %vm275_vm3, %v3598_v2, 0.0  ;;  %v2315_v24 = vsel %vm275_vm3, %v2313_v41, %v2301_v19  ;;  %v2900_v19 = vld [vmem:[%s4272_s9 + $0x78] sm:$0xff] }
0x1889   :  { %2195 = vadd.xlane.f32.xlu0 %v2194_v3 }
0x189f   :  { %2290 = vrot.lane.b32.xlu0 %v4095_v1, %s4288_s17  ;;  %v2877_v1 = vld [vmem:[%s4267_s4 + $0x28] sm:$0xff] }
0x18a0   :  { %v3387_v13 = vpack.c.bf16 %v2877_v1, %v2876_v12 }
0x18a2   :  { %3388 = vmatprep.subr.bf16.mxu0 %v3387_v13 }
0x1912   :  { %v2193_v6 = vpop.xlane.xlu0 %2192 }
0x1913   :  { %3599 = vrcp.f32 %v2193_v6 }
0x1916   :  { %v2196_v7 = vpop.xlane.xlu0 %2195 }
0x1917   :  { %3601 = vrcp.f32 %v2196_v7 }
0x191a   :  { %v2291_v18 = vpop.permute.xlu0 %2290 }
0x191b   :  { %v2312_v42 = vsel %vm191_vm1, %v4091_v0, %v2291_v18  ;;  %v2881_v0 = vld [vmem:[%s4268_s5 + $0x1] ss:$0 sm:$0xff]  ;;  %v2899_v18 = vld [vmem:[%s4272_s9 + $0x70] sm:$0xff] }
0x191c   :  { %v2314_v21 = vsel %vm275_vm3, %v2312_v42, %v2299_v17  ;;  %v3415_v42 = vpack.c.bf16 %v2900_v19, %v2899_v18 }
0x191d   :  { %v3600_v8 = vpop.eup %3599 }
0x191e   :  { %v2199_v9 = vmul.f32 %v3600_v8, %v3596_v44 }
0x1920   :  { %3204 = vmatprep.mubr.msk.f32.mxu0 %vm275_vm3, %v2199_v9 }
0x1921   :  { %v3602_v10 = vpop.eup %3601 }
0x1922   :  { %v2200_v11 = vmul.f32 %v3602_v10, %v3598_v2  ;;  %v4185_v2 = vld [vmem:[%s4269_s6 + $0x4] sm:$0xf] }
0x1923   :  { %v2445_v3 = vrot.slane %v4185_v2, %v3759_v28  ;;  %v2451_v8 = vrot.slane %v4185_v2, %v3765_v30  ;;  %v2894_v28 = vld [vmem:[%s4272_s9 + $0x48] sm:$0xff]  ;;  %v2895_v30 = vld [vmem:[%s4272_s9 + $0x50] sm:$0xff] }
0x1924   :  { %3205 = vmatmul.mubr.msk.f32.vlgmr.msra.gmra.mrb[18].mxu0 %vm275_vm3, %v2200_v11 }
0x1925   :  { %3390 = vmatpush3.bf16.msra.mxu0 %v3387_v13  ;;  %v2893_v13 = vld [vmem:[%s4272_s9 + $0x40] sm:$0xff] }
0x1926   :  { %3392 = vmatprep.subr.bf16.mxu0 %v3391_v52  ;;  %v3403_v14 = vpack.c.bf16 %v2894_v28, %v2893_v13  ;;  %v3657_v28 = vmov 0.0  }
0x1929   :  { %3394 = vmatpush3.bf16.msra.mxu0 %v3391_v52  ;;  %v2896_v52 = vld [vmem:[%s4272_s9 + $0x58] sm:$0xff] }
0x192a   :  { %3404 = vmatprep.subr.bf16.mxu0 %v3403_v14 }
0x19f7   :  { %v3206_v54 = vpop.f32.mrb[18].mxu0 }
0x19f8   :  { %2308 = vrot.lane.b32.xlu1 %v3206_v54, %s4290_s26  ;;  %v2279_v15 = vpop.f32.mrb[19].mxu0  ;;  %v3407_v54 = vpack.c.bf16 %v2896_v52, %v2895_v30 }
0x19f9   :  { %2306 = vrot.lane.b32.xlu0 %v2279_v15, %s4290_s26  ;;  %v2897_v15 = vld [vmem:[%s4272_s9 + $0x60] sm:$0xff] }
0x19fa   :  { %v3411_v17 = vpack.c.bf16 %v2898_v16, %v2897_v15 }
0x1a6a   :  { %v2309_v20 = vpop.permute.xlu1 %2308 }
0x1a6b   :  { %v2307_v45 = vpop.permute.xlu0 %2306  ;;  %v2317_v29 = vsel %vm1013_vm4, %v2315_v24, %v2309_v20  ;;  %v2890_v20 = vld [vmem:[%s4271_s8 + $0x1] ss:$0 sm:$0xff] }
0x1a6c   :  { %v2316_v27 = vsel %vm1013_vm4, %v2314_v21, %v2307_v45 }
0x1a6d   :  { %3215 = vmatprep.mubr.msk.f32.mxu0 %vm51_vm0, %v2316_v27 }
0x1a6e   :  { %3216 = vmatmul.mubr.msk.f32.vlgmr.msra.gmra.mrb[20].mxu0 %vm51_vm0, %v2317_v29 }
0x1a6f   :  { %3406 = vmatpush3.bf16.msra.mxu0 %v3403_v14 }
0x1a70   :  { %3408 = vmatprep.subr.bf16.mxu0 %v3407_v54 }
0x1a73   :  { %3410 = vmatpush3.bf16.msra.mxu0 %v3407_v54 }
0x1a74   :  { %3412 = vmatprep.subr.bf16.mxu0 %v3411_v17 }
0x1a77   :  { %3414 = vmatpush3.bf16.msra.mxu0 %v3411_v17  ;;  %v2695_v17 = vrot.slane %v4185_v2, %v1386_v43  ;;  %v2905_v43 = vld [vmem:[%s4276_s13] ss:$0 sm:$0xff] }
0x1a78   :  { %3416 = vmatprep.subr.bf16.mxu0 %v3415_v42 }
0x1a7b   :  { %3418 = vmatpush3.bf16.msra.mxu0 %v3415_v42 }
0x1b41   :  { %v3217_v31 = vpop.f32.mrb[20].mxu0 }
0x1b42   :  { %v2409_v32 = vadd.f32 %v3217_v31, %v2881_v0  ;;  %v2403_v63 = vpop.f32.mrb[21].mxu0 }
0x1b43   :  { %v2404_v33 = vadd.f32 %v2881_v0, %v2403_v63 }
0x1b44   :  { %v2415_v23 = vadd.f32 %v2409_v32, %v4018_v36 }
0x1b45   :  { %v2414_v34 = vadd.f32 %v2404_v33, %v4016_v22  ;;  %v2885_v22 = vld [vmem:[%s4270_s7 + $0x20] sm:$0xff]  ;;  %s3658_s7 = smov [#allocation2]  }
0x1b46   :  { %v2419_v35 = vsel %vm51_vm0, %v2415_v23, 0.0  ;;  %v3395_v57 = vpack.c.bf16 %v2886_v56, %v2885_v22  ;;  %s2800_s17 = sshll.u32 %s3658_s7, 4  ;;  %s2801_s17 = int_to_ptr.vmem [resolvable:$true] %s2800_s17 }
0x1b47   :  { %2420 = vadd.xlane.f32.xlu1 %v2419_v35  ;;  %v2416_v37 = vsel %vm51_vm0, %v2414_v34, 0.0  ;;  %s3617_s18 = scalar_lea.vmem %s2801_s17, 32  ;;  %p3622_p1 = scmp.lt.s32.totalorder %s2801_s17, %s2801_s17 }
0x1b48   :  { %2417 = vadd.xlane.f32.xlu0 %v2416_v37  ;;  %3396 = vmatprep.subr.bf16.mxu1 %v3395_v57  ;;  %p3618_p0 = scmp.ne.s32.totalorder %s2801_s17, %s3617_s18  ;;  %p3623_p2 = scmp.lt.s32.totalorder %s3617_s18, %s3617_s18 }
0x1b49   :  { %3398 = vmatpush3.bf16.msra.mxu1 %v3395_v57 }
0x1b4a   :  { %3400 = vmatprep.subr.bf16.mxu1 %v3399_v58  ;;  %p3624_p3 = por %p3623_p2, %p3622_p1 }
0x1b4c   :  { %p3625_p4 = pnand %p3624_p3, %p3618_p0 }
0x1b4d   :  { %3402 = vmatpush3.bf16.msra.mxu1 %v3399_v58 }
0x1bd4   :  { %v2421_v39 = vpop.xlane.xlu1 %2420 }
0x1bd5   :  { %v2423_v5 = vmul.f32 0.03125, %v2421_v39  ;;  %v2418_v47 = vpop.xlane.xlu0 %2417 }
0x1bd6   :  { %v2422_v48 = vmul.f32 0.03125, %v2418_v47 }
0x1bd7   :  { %v2425_v49 = vsub.f32 %v2415_v23, %v2423_v5 }
0x1bd8   :  { %v2424_v51 = vsub.f32 %v2414_v34, %v2422_v48 }
0x1bd9   :  { %v2427_v50 = vmul.f32 %v2425_v49, %v2425_v49 }
0x1bda   :  { %v2426_v53 = vmul.f32 %v2424_v51, %v2424_v51 }
0x1bdb   :  { %v2431_v36 = vsel %vm51_vm0, %v2427_v50, 0.0 }
0x1bdc   :  { %v2428_v55 = vsel %vm51_vm0, %v2426_v53, 0.0 }
0x1bdd   :  { %2429 = vadd.xlane.f32.xlu0 %v2428_v55  ;;  %v2902_v55 = vld [vmem:[%s4273_s10 + $0x1] ss:$0 sm:$0xff] }
0x1be1   :  { %2432 = vadd.xlane.f32.xlu0 %v2431_v36 }
0x1c6a   :  { %v2430_v59 = vpop.xlane.xlu0 %2429 }
0x1c6b   :  { %v2434_v60 = vmul.f32 0.03125, %v2430_v59 }
0x1c6d   :  { %v2436_v61 = vadd.f32 1e-12, %v2434_v60 }
0x1c6e   :  { %v2433_v62 = vpop.xlane.xlu0 %2432 }
0x1c6f   :  { %3603 = vrsqrt.f32 %v2436_v61  ;;  %v2435_v44 = vmul.f32 0.03125, %v2433_v62 }
0x1c71   :  { %v2437_v46 = vadd.f32 1e-12, %v2435_v44 }
0x1c73   :  { %3605 = vrsqrt.f32 %v2437_v46 }
0x1c79   :  { %v3604_v6 = vpop.eup %3603 }
0x1c7a   :  { %v2440_v7 = vmul.f32 %v3604_v6, %v2424_v51 }
0x1c7c   :  { %v2446_v9 = vmul.f32 %v2445_v3, %v2440_v7 }
0x1c7d   :  { %v3606_v10 = vpop.eup %3605 }
0x1c7e   :  { %v2441_v11 = vmul.f32 %v3606_v10, %v2425_v49  ;;  %v2452_v12 = vadd.f32 %v2451_v8, %v2446_v9  ;;  %v2709_v9 = vld [vmem:[%s4275_s12] sm:$0xff]  ;;  %v2710_v10 = vld [vmem:[%s4275_s12 + $0x8] sm:$0xff] }
0x1c80   :  { %v2447_v1 = vmul.f32 %v2445_v3, %v2441_v11  ;;  %3226 = vmatprep.mubr.msk.f32.mxu1 %vm51_vm0, %v2452_v12  ;;  %v3420_v11 = vpack.c.bf16 %v2710_v10, %v2709_v9 }
0x1c82   :  { %v2453_v4 = vadd.f32 %v2451_v8, %v2447_v1  ;;  %v2711_v1 = vld [vmem:[%s4275_s12 + $0x10] sm:$0xff] }
0x1c84   :  { %3227 = vmatmul.mubr.msk.f32.vlgmr.msra.gmra.mrb[22].mxu1 %vm51_vm0, %v2453_v4 }
0x1c85   :  { %3256 = vmatprep.mubr.msk.f32.mxu1 %vm3656_vm6, %v3657_v28 }
0x1d57   :  { %v3228_v41 = vpop.f32.mrb[22].mxu1 }
0x1d58   :  { %v2545_v21 = vadd.f32 %v3228_v41, %v2890_v20  ;;  %v2539_v45 = vpop.f32.mrb[23].mxu1 }
0x1d59   :  { %v2540_v24 = vadd.f32 %v2890_v20, %v2539_v45  ;;  %v2701_v20 = vrot.slane %v4185_v2, %v1392_v25 }
0x1d5a   :  { %v2549_v27 = vmul.f32 %v2545_v21, %v2545_v21 }
0x1d5b   :  { %v2548_v29 = vmul.f32 %v2540_v24, %v2540_v24 }
0x1d5c   :  { %v2551_v0 = vmul.f32 %v2549_v27, %v2545_v21 }
0x1d5d   :  { %v2550_v31 = vmul.f32 %v2548_v29, %v2540_v24 }
0x1d5e   :  { %v2553_v32 = vmul.f32 0.044715, %v2551_v0 }
0x1d5f   :  { %v2552_v63 = vmul.f32 0.044715, %v2550_v31 }
0x1d60   :  { %v2555_v33 = vadd.f32 %v2553_v32, %v2545_v21 }
0x1d61   :  { %v2554_v23 = vadd.f32 %v2552_v63, %v2540_v24 }
0x1d62   :  { %v2557_v34 = vmul.f32 0.7978846, %v2555_v33 }
0x1d63   :  { %v2556_v35 = vmul.f32 0.7978846, %v2554_v23 }
0x1d64   :  { %3607 = vtanh.f32 %v2557_v34 }
0x1d65   :  { %3609 = vtanh.f32 %v2556_v35 }
0x1d6e   :  { %v3608_v37 = vpop.eup %3607 }
0x1d6f   :  { %v3610_v39 = vpop.eup %3609  ;;  %v2561_v5 = vadd.f32 1.0, %v3608_v37 }
0x1d70   :  { %v2560_v47 = vadd.f32 1.0, %v3610_v39 }
0x1d71   :  { %v2563_v48 = vmul.f32 0.5, %v2561_v5 }
0x1d72   :  { %v2562_v49 = vmul.f32 0.5, %v2560_v47 }
0x1d73   :  { %v2565_v53 = vmul.f32 %v2563_v48, %v2545_v21 }
0x1d74   :  { %v2564_v51 = vmul.f32 %v2562_v49, %v2540_v24 }
0x1d76   :  { %3245 = vmatprep.mubr.msk.f32.mxu0 %vm1274_vm5, %v2564_v51 }
0x1d77   :  { %3246 = vmatmul.mubr.msk.f32.vlgmr.msra.gmra.mrb[22].mxu0 %vm1274_vm5, %v2565_v53 }
0x1e4a   :  { %v3247_v50 = vpop.f32.mrb[22].mxu0 }
0x1e4b   :  { %v2661_v36 = vadd.f32 %v3247_v50, %v2902_v55  ;;  %v2655_v22 = vpop.f32.mrb[23].mxu0 }
0x1e4c   :  { %v2656_v56 = vadd.f32 %v2902_v55, %v2655_v22 }
0x1e4d   :  { %v2665_v57 = vadd.f32 %v2661_v36, %v2453_v4  ;;  %v2712_v4 = vld [vmem:[%s4275_s12 + $0x18] sm:$0xff] }
0x1e4e   :  { %v2664_v40 = vadd.f32 %v2656_v56, %v2452_v12  ;;  %v3655_v12 = vmov 0.0|0.0   ;;  %v3423_v13 = vpack.c.bf16 %v2712_v4, %v2711_v1 }
0x1e4f   :  { %v2669_v38 = vsel %vm51_vm0, %v2665_v57, 0.0  ;;  %3419 = vmatprep.subr.bf16.mxu1 %v3655_v12 }
0x1e50   :  { %2670 = vadd.xlane.f32.xlu0 %v2669_v38  ;;  %v2666_v58 = vsel %vm51_vm0, %v2664_v40, 0.0  ;;  %3421 = vmatpush3.bf16.msra.mxu1 %v3420_v11 }
0x1e51   :  { %2667 = vadd.xlane.f32.xlu1 %v2666_v58  ;;  %3422 = vmatprep.subr.bf16.mxu1 %v3655_v12 }
0x1e54   :  { %3424 = vmatpush3.bf16.msra.mxu1 %v3423_v13 }
0x1edd   :  { %v2671_v59 = vpop.xlane.xlu0 %2670 }
0x1ede   :  { %v2673_v60 = vmul.f32 0.03125, %v2671_v59  ;;  %v2668_v61 = vpop.xlane.xlu1 %2667 }
0x1edf   :  { %v2672_v62 = vmul.f32 0.03125, %v2668_v61 }
0x1ee0   :  { %v2675_v44 = vsub.f32 %v2665_v57, %v2673_v60 }
0x1ee1   :  { %v2674_v46 = vsub.f32 %v2664_v40, %v2672_v62 }
0x1ee2   :  { %v2677_v3 = vmul.f32 %v2675_v44, %v2675_v44 }
0x1ee3   :  { %v2676_v6 = vmul.f32 %v2674_v46, %v2674_v46 }
0x1ee4   :  { %v2681_v7 = vsel %vm51_vm0, %v2677_v3, 0.0 }
0x1ee5   :  { %2682 = vadd.xlane.f32.xlu0 %v2681_v7  ;;  %v2678_v8 = vsel %vm51_vm0, %v2676_v6, 0.0 }
0x1ee6   :  { %2679 = vadd.xlane.f32.xlu1 %v2678_v8 }
0x1f72   :  { %v2683_v14 = vpop.xlane.xlu0 %2682 }
0x1f73   :  { %v2685_v30 = vmul.f32 0.03125, %v2683_v14  ;;  %v2680_v52 = vpop.xlane.xlu1 %2679 }
0x1f74   :  { %v2684_v54 = vmul.f32 0.03125, %v2680_v52 }
0x1f75   :  { %v2687_v15 = vadd.f32 1e-12, %v2685_v30 }
0x1f76   :  { %v2686_v16 = vadd.f32 1e-12, %v2684_v54 }
0x1f77   :  { %3611 = vrsqrt.f32 %v2687_v15 }
0x1f78   :  { %3613 = vrsqrt.f32 %v2686_v16 }
0x1f81   :  { %v3612_v18 = vpop.eup %3611 }
0x1f82   :  { %v3614_v19 = vpop.eup %3613  ;;  %v2691_v42 = vmul.f32 %v3612_v18, %v2675_v44 }
0x1f83   :  { %v2690_v41 = vmul.f32 %v3614_v19, %v2674_v46 }
0x1f84   :  { %v2697_v21 = vmul.f32 %v2695_v17, %v2691_v42 }
0x1f85   :  { %v2696_v45 = vmul.f32 %v2695_v17, %v2690_v41 }
0x1f86   :  { %v2703_v24 = vadd.f32 %v2701_v20, %v2697_v21 }
0x1f87   :  { %v2702_v27 = vadd.f32 %v2701_v20, %v2696_v45 }
0x1f88   :  { %v2705_v29 = vrot.slane %v2703_v24, 7 }
0x1f8a   :  { %v2708_v0 = vsel %vm2707_vm7, %v2702_v27, %v2705_v29 }
0x1f8b   :  { %3257 = vmatmul.mubr.msk.f32.vlgmr.msra.gmra.mrb[24].mxu1 %vm51_vm0, %v2708_v0 }
0x205e   :  { %v2789_v31 = vpop.f32.mrb[24].mxu1 }
0x205f   :  { %v2790_v26 = vadd.f32 %v2905_v43, %v2789_v31  ;;  %v3258_v32 = vpop.f32.mrb[25].mxu1 }
0x2061   :  { %2793 = vst [vmem:[#allocation2] sm:$0x3] %v2790_v26 }
0x2062   :  { %3628 = shalt.err (!%p3625_p4)
}
0x2063   :  { %s3629_s21 = scalar_lea.hbm %s4277_s14, 32 }
0x2064   :  { %p3630_p5 = scmp.ne.s32.totalorder %s4277_s14, %s3629_s21  ;;  %p3633_p6 = scmp.lt.u32.totalorder %s3629_s21, %s4277_s14 }
0x2066   :  { %p3635_p7 = pnand %p3633_p6, %p3630_p5 }
0x2068   :  { %3638 = shalt.err (!%p3635_p7)
}
0x2069   :  { %2803 = dma.vmem_to_hbm [thread:$0]  %s2801_s17, 32, %s4277_s14, [#allocation3]  }
0x206a   :  { %3639 = dma.done.wait [#allocation3], 32  }
0x206b   :  { %3640 = vsyncadd [#allocation3], 4294967264 }
0x206c   :  { %2807 = vsyncpa [#allocation3], 1 }

</bundles_post_ra>
